<compile_context>
chip_gen: v7x
topology: tpu7x:2x2x1
jax: 0.10.0
libtpu: 0.0.40
codegen_flags: <defaults>
</compile_context>

<pallas_src>
import functools

import jax
import jax.numpy as jnp
import numpy as np
from jax import lax
from jax.experimental import pallas as pl
from jax.experimental.pallas import tpu as pltpu


# ----------------------------------------------------------------------------
# Host-side glue (matches the PyTorch/DGL classmethods).
# ----------------------------------------------------------------------------
def compute_gamma(alpha, beta, k):
    return float(np.power(beta, k) + alpha * np.sum([np.power(beta, i) for i in range(k)]))


def build_norm_adj(user_item_edges, num_users, num_items):
    """Dense equivalent of MGDCF.build_homo_graph + MGDCF.norm_adj."""
    n = num_users + num_items
    adj = np.zeros((n, n), dtype=np.float32)
    user_idx, item_idx = user_item_edges.T
    homo_item_idx = item_idx + num_users
    adj[user_idx, homo_item_idx] = 1.0      # src -> dst
    adj[homo_item_idx, user_idx] = 1.0      # add_reverse_edges (+ to_simple dedup)
    adj[np.arange(n), np.arange(n)] = 1.0   # add_self_loop
    degs = adj.sum(axis=0)                  # in-degrees (symmetric graph)
    norm = np.power(degs, -0.5)
    # edge weight w(u,v) = deg(u)^-0.5 * deg(v)^-0.5, aggregated over dst.
    return (norm[:, None] * adj * norm[None, :]).astype(np.float32)


def _round_up(x, m):
    return ((x + m - 1) // m) * m


def _pad2d(arr, rows, cols):
    pr, pc = rows - arr.shape[0], cols - arr.shape[1]
    if pr == 0 and pc == 0:
        return arr
    return jnp.pad(arr, ((0, pr), (0, pc)))


def _vmem_capacity_bytes():
    try:
        return int(pltpu.get_tpu_info().vmem_capacity_bytes)
    except Exception:
        return 64 * 1024 * 1024   # conservative default (v7x per-TC VMEM)


# ----------------------------------------------------------------------------
# Kernels.
# ----------------------------------------------------------------------------
def _mgdcf_resident_kernel(a_ref, h0_ref, o_ref, *, k, alpha, inv_gamma):
    """A (beta folded in) resident in VMEM; grid is over D column tiles."""
    a = a_ref[...]                                    # (Np, Np), bf16 by default
    h0 = h0_ref[...].astype(jnp.float32)              # (Np, td)
    h0a = h0 * alpha                                  # hoisted out of the loop

    def body(_, h):
        # Native bf16 MXU matmul with f32 accumulation; the h state stays f32.
        return jnp.dot(a, h.astype(a.dtype),
                       preferred_element_type=jnp.float32) + h0a

    h = lax.fori_loop(0, k, body, h0, unroll=(k <= 8))
    o_ref[...] = (h * inv_gamma).astype(o_ref.dtype)


def _mgdcf_streamed_kernel(h0_kk_ref, h0_row_ref, a_ref, o_ref, carry_ref, acc_ref,
                           *, k, alpha, inv_gamma, np_pad, tm, tk):
    """A streamed in (tm, tk) tiles; h carried in a ping-pong f32 VMEM scratch.

    grid = (D-tiles, k, row-tiles, K-reduction)   (reduction innermost)
    carry_ref : (2 * np_pad, td) f32 -- slot s%2 holds h_s, slot (s+1)%2 gets h_{s+1}.
    h0 is fed via two small per-tile blocks (no full-column resident slab):
      h0_kk_ref : (tk, td) contraction tile, only meaningful at (s==0, i==0),
                  used both to populate carry slot 0 and as the step-0 operand.
      h0_row_ref: (tm, td) row tile for the alpha*h0 epilogue.
    """
    s = pl.program_id(1)     # propagation step
    i = pl.program_id(2)     # output row tile
    kk = pl.program_id(3)    # contraction tile
    nk = pl.num_programs(3)

    # Zero the f32 accumulator at the start of each contraction.
    @pl.when(kk == 0)
    def _():
        acc_ref[...] = jnp.zeros_like(acc_ref)

    # First pass of the first step: populate carry slot 0 with h0, tile by tile.
    @pl.when((s == 0) & (i == 0))
    def _():
        carry_ref[pl.ds(pl.multiple_of(kk * tk, tk), tk), :] = (
            h0_kk_ref[...].astype(jnp.float32))

    a_blk = a_ref[...]                                               # (tm, tk)
    in_base = (s % 2) * np_pad
    h_in = carry_ref[pl.ds(pl.multiple_of(in_base + kk * tk, tk), tk), :]
    acc_ref[...] += jnp.dot(a_blk, h_in.astype(a_blk.dtype),
                            preferred_element_type=jnp.float32)

    # End of the contraction: finish this propagation step for this row tile.
    @pl.when(kk == nk - 1)
    def _():
        h_new = acc_ref[...] + h0_row_ref[...].astype(jnp.float32) * alpha
        out_base = ((s + 1) % 2) * np_pad
        carry_ref[pl.ds(pl.multiple_of(out_base + i * tm, tm), tm), :] = h_new
        scale = jnp.where(s == k - 1, inv_gamma, 1.0)                # fold 1/gamma
        o_ref[...] = (h_new * scale).astype(o_ref.dtype)


# ----------------------------------------------------------------------------
# Wrapper (MGDCF.forward, eval mode).
# ----------------------------------------------------------------------------
def mgdcf_forward(a_norm, x, *, k, alpha, beta,
                  a_dtype=jnp.bfloat16, force_streamed=False):
    n, d = x.shape
    assert a_norm.shape == (n, n)
    gamma = compute_gamma(alpha, beta, k)
    inv_gamma = float(1.0 / gamma)
    x = jnp.asarray(x)
    out_dtype = x.dtype

    if k == 0:
        return (x * inv_gamma).astype(out_dtype)

    # Fold beta into A once and store A in its (bf16 by default) streaming dtype:
    # the MXU is natively bf16 on v5e/v6e/v7x and bf16 halves VMEM/HBM traffic.
    a_beta = (jnp.asarray(a_norm, jnp.float32) * beta).astype(a_dtype)
    a_bytes = jnp.dtype(a_dtype).itemsize
    x_bytes = jnp.dtype(out_dtype).itemsize

    vmem_cap = _vmem_capacity_bytes()

    # ---------------- resident-A regime sizing ------------------------------
    np_res = _round_up(n, 128)
    dp_res = _round_up(d, 128)
    # >= 2 D-column tiles when possible so the "parallel" axis engages both TCs.
    if dp_res >= 512 and dp_res % 256 == 0:
        td_res = 256
    elif dp_res > 128:
        td_res = 128
    else:
        td_res = dp_res
    resident_need = (np_res * np_res * a_bytes         # A resident, single-buffered
                     + 4 * np_res * td_res * x_bytes   # h0 / out blocks (x2 buffers)
                     + 3 * np_res * td_res * 4)        # f32 temps (h, h0a, dot out)
    # 16 MiB headroom for compiler scratch / semaphores.
    use_resident = (not force_streamed) and (resident_need <= vmem_cap - (16 << 20))

    if use_resident:
        a_p = _pad2d(a_beta, np_res, np_res)
        x_p = _pad2d(x, np_res, dp_res)
        vmem_limit = int(min(vmem_cap - (8 << 20),
                             max(32 << 20, resident_need + (16 << 20))))
        cost = pl.CostEstimate(
            flops=2 * k * np_res * np_res * dp_res,
            transcendentals=0,
            bytes_accessed=np_res * np_res * a_bytes + 2 * np_res * dp_res * x_bytes)
        kernel = functools.partial(_mgdcf_resident_kernel,
                                   k=k, alpha=float(alpha), inv_gamma=inv_gamma)

        def call_resident(single_buffer_a):
            if single_buffer_a:
                # A's index map is constant -> no point double-buffering it.
                a_spec = pl.BlockSpec((np_res, np_res), lambda j: (0, 0),
                                      pipeline_mode=pl.Buffered(1))
            else:
                a_spec = pl.BlockSpec((np_res, np_res), lambda j: (0, 0))
            return pl.pallas_call(
                kernel,
                out_shape=jax.ShapeDtypeStruct((np_res, dp_res), out_dtype),
                grid_spec=pltpu.PrefetchScalarGridSpec(
                    num_scalar_prefetch=0,
                    grid=(dp_res // td_res,),
                    in_specs=[
                        a_spec,                                            # A resident
                        pl.BlockSpec((np_res, td_res), lambda j: (0, j)),  # h0 D-tile
                    ],
                    out_specs=pl.BlockSpec((np_res, td_res), lambda j: (0, j)),
                ),
                compiler_params=pltpu.CompilerParams(
                    dimension_semantics=("parallel",),     # megacore over D tiles
                    vmem_limit_bytes=vmem_limit),
                cost_estimate=cost,
            )(a_p, x_p)

        try:
            out = call_resident(True)
        except Exception:
            # pipeline_mode=Buffered(1) not supported -> default double buffering.
            out = call_resident(False)
        return out[:n, :d]

    # ---------------- streamed-A regime --------------------------------------
    # Large MXU-aligned tiles so the ~0.35 us per-grid-step overhead is amortized.
    if n >= 512:
        t = 512
        np_str = _round_up(n, t)
    else:
        np_str = _round_up(n, 128)
        t = np_str
    tm = tk = t

    dp = _round_up(d, 128)

    def streamed_need(td_):
        return (2 * np_str * td_ * 4           # ping-pong h carry (f32)
                + tm * td_ * 4                 # f32 accumulator
                + 2 * tm * tk * a_bytes        # A tile double buffer
                + 2 * tk * td_ * x_bytes       # h0 contraction tile (x2 buffers)
                + 2 * tm * td_ * x_bytes       # h0 row tile (x2 buffers)
                + 2 * tm * td_ * x_bytes)      # out block (x2 buffers)

    # Choose td as large as fits (ideally td == dp so A is streamed only k times).
    budget = vmem_cap - (16 << 20)
    cands = sorted({c for c in (dp, 512, 384, 256, 128)
                    if c <= dp and dp % c == 0 and c % 128 == 0}, reverse=True)
    td = cands[-1]
    for c in cands:
        if streamed_need(c) <= budget:
            td = c
            break

    n_row, n_red, n_col = np_str // tm, np_str // tk, dp // td
    need = streamed_need(td)
    vmem_limit = int(min(vmem_cap - (8 << 20), max(32 << 20, need + (16 << 20))))

    a_p = _pad2d(a_beta, np_str, np_str)
    x_p = _pad2d(x, np_str, dp)
    cost = pl.CostEstimate(
        flops=2 * k * np_str * np_str * dp,
        transcendentals=0,
        bytes_accessed=(k * n_col * np_str * np_str * a_bytes
                        + (1 + k) * np_str * dp * x_bytes))

    def h0_kk_map(dd, s, i, kk):
        # Only stream the h0 contraction tile during the very first pass
        # (s==0, i==0); afterwards keep it parked on block (0, dd).
        first = jnp.logical_and(s == 0, i == 0)
        return (jnp.where(first, kk, 0), dd)

    out = pl.pallas_call(
        functools.partial(_mgdcf_streamed_kernel, k=k, alpha=float(alpha),
                          inv_gamma=inv_gamma, np_pad=np_str, tm=tm, tk=tk),
        out_shape=jax.ShapeDtypeStruct((np_str, dp), out_dtype),
        grid_spec=pltpu.PrefetchScalarGridSpec(
            num_scalar_prefetch=0,
            grid=(n_col, k, n_row, n_red),
            in_specs=[
                pl.BlockSpec((tk, td), h0_kk_map),                       # h0 K-tile
                pl.BlockSpec((tm, td), lambda dd, s, i, kk: (i, dd)),    # h0 row tile
                pl.BlockSpec((tm, tk), lambda dd, s, i, kk: (i, kk)),    # A tile
            ],
            out_specs=pl.BlockSpec((tm, td), lambda dd, s, i, kk: (i, dd)),
            scratch_shapes=[
                pltpu.VMEM((2 * np_str, td), jnp.float32),   # ping-pong h carry
                pltpu.VMEM((tm, td), jnp.float32),           # f32 accumulator
            ],
        ),
        compiler_params=pltpu.CompilerParams(
            dimension_semantics=("parallel", "arbitrary", "arbitrary", "arbitrary"),
            vmem_limit_bytes=vmem_limit),
        cost_estimate=cost,
    )(x_p, x_p, a_p)
    return out[:n, :d]


# ----------------------------------------------------------------------------
# Demo / correctness check.
# ----------------------------------------------------------------------------
if __name__ == "__main__":
    k, alpha, beta = 4, 0.1, 0.9
    x_drop_rate = edge_drop_rate = z_drop_rate = 0.1   # identity in eval mode
    gamma = compute_gamma(alpha, beta, k)

    def reference(a, h0):
        h = h0
        for _ in range(k):
            h = (a @ h) * beta + h0 * alpha
        return h / gamma

    # ---- demo 1: small graph -> resident-A regime ---------------------------
    num_users, num_items, emb_dim = 48, 52, 64
    n = num_users + num_items
    rng = np.random.RandomState(0)
    edges = np.stack([rng.randint(0, num_users, size=400),
                      rng.randint(0, num_items, size=400)], axis=1)
    a_norm = jnp.asarray(build_norm_adj(edges, num_users, num_items))
    x = jax.random.normal(jax.random.PRNGKey(0), (n, emb_dim), dtype=jnp.float32)
    ref1 = np.asarray(reference(a_norm, x))

    # (a) f32 A: tight check of the kernel plumbing.
    out1 = jax.block_until_ready(
        mgdcf_forward(a_norm, x, k=k, alpha=alpha, beta=beta, a_dtype=jnp.float32))
    np.testing.assert_allclose(np.asarray(out1), ref1, rtol=1e-4, atol=1e-4)

    # (b) default bf16 A (MXU-native) -> loosened tolerance.
    out1b = jax.block_until_ready(mgdcf_forward(a_norm, x, k=k, alpha=alpha, beta=beta))
    np.testing.assert_allclose(np.asarray(out1b), ref1, rtol=5e-2, atol=5e-2)

    # ---- demo 2: larger graph -> streamed-A regime (bf16 A, f32 carry) ------
    num_users2, num_items2, emb_dim2 = 256, 256, 128
    n2 = num_users2 + num_items2
    rng2 = np.random.RandomState(1)
    edges2 = np.stack([rng2.randint(0, num_users2, size=4096),
                       rng2.randint(0, num_items2, size=4096)], axis=1)
    a_norm2 = jnp.asarray(build_norm_adj(edges2, num_users2, num_items2))
    x2 = jax.random.normal(jax.random.PRNGKey(0), (n2, emb_dim2), dtype=jnp.float32)

    out2 = jax.block_until_ready(
        mgdcf_forward(a_norm2, x2, k=k, alpha=alpha, beta=beta, force_streamed=True))
    ref2 = reference(a_norm2, x2)
    # bf16 A storage (f32 accumulation) -> loosened tolerance.
    np.testing.assert_allclose(np.asarray(out2), np.asarray(ref2), rtol=5e-2, atol=5e-2)

    print("KERNEL_OK")
</pallas_src>

<mosaic_0001>
module attributes {stable_mosaic.version = 11 : i64} {
  func.func @_mgdcf_resident_kernel(%arg0: i32, %arg1: memref<128x128xf32, #tpu.memory_space<vmem>>, %arg2: memref<128x128xf32, #tpu.memory_space<vmem>>, %arg3: memref<128x128xf32, #tpu.memory_space<vmem>>) attributes {dimension_semantics = [#tpu.dimension_semantics<parallel>], iteration_bounds = array<i64: 1>, scalar_prefetch = 0 : i64, scratch_operands = 0 : i64, tpu.core_type = #tpu.core_type<tc>, window_params = [{pipeline_mode = #tpu.pipeline_mode<synchronous>, transform_indices = @transform_0, window_bounds = array<i64: 128, 128>}, {transform_indices = @transform_1, window_bounds = array<i64: 128, 128>}, {transform_indices = @transform_2, window_bounds = array<i64: 128, 128>}]} {
    %c0 = arith.constant 0 : index
    %c0_0 = arith.constant 0 : index
    %0 = vector.load %arg1[%c0, %c0_0] : memref<128x128xf32, #tpu.memory_space<vmem>>, vector<128x128xf32>
    %c0_1 = arith.constant 0 : index
    %c0_2 = arith.constant 0 : index
    %1 = vector.load %arg2[%c0_1, %c0_2] : memref<128x128xf32, #tpu.memory_space<vmem>>, vector<128x128xf32>
    %cst = arith.constant 1.000000e-01 : f32
    %2 = vector.broadcast %cst : f32 to vector<128x128xf32>
    %3 = arith.mulf %1, %2 : vector<128x128xf32>
    %c0_i32 = arith.constant 0 : i32
    %cst_3 = arith.constant dense<0.000000e+00> : vector<128x128xf32>
    %4 = tpu.matmul %0, %1, %cst_3 {dimension_numbers = #tpu.dot_dimension_numbers<[1], [0], [0], [1], [0, 0, 1, 1], [], []>} : vector<128x128xf32>, vector<128x128xf32>, vector<128x128xf32> -> vector<128x128xf32>
    %5 = arith.addf %4, %3 : vector<128x128xf32>
    %c1_i32 = arith.constant 1 : i32
    %cst_4 = arith.constant dense<0.000000e+00> : vector<128x128xf32>
    %6 = tpu.matmul %0, %5, %cst_4 {dimension_numbers = #tpu.dot_dimension_numbers<[1], [0], [0], [1], [0, 0, 1, 1], [], []>} : vector<128x128xf32>, vector<128x128xf32>, vector<128x128xf32> -> vector<128x128xf32>
    %7 = arith.addf %6, %3 : vector<128x128xf32>
    %c2_i32 = arith.constant 2 : i32
    %cst_5 = arith.constant dense<0.000000e+00> : vector<128x128xf32>
    %8 = tpu.matmul %0, %7, %cst_5 {dimension_numbers = #tpu.dot_dimension_numbers<[1], [0], [0], [1], [0, 0, 1, 1], [], []>} : vector<128x128xf32>, vector<128x128xf32>, vector<128x128xf32> -> vector<128x128xf32>
    %9 = arith.addf %8, %3 : vector<128x128xf32>
    %c3_i32 = arith.constant 3 : i32
    %cst_6 = arith.constant dense<0.000000e+00> : vector<128x128xf32>
    %10 = tpu.matmul %0, %9, %cst_6 {dimension_numbers = #tpu.dot_dimension_numbers<[1], [0], [0], [1], [0, 0, 1, 1], [], []>} : vector<128x128xf32>, vector<128x128xf32>, vector<128x128xf32> -> vector<128x128xf32>
    %11 = arith.addf %10, %3 : vector<128x128xf32>
    %cst_7 = arith.constant 1.000000e+00 : f32
    %12 = vector.broadcast %cst_7 : f32 to vector<128x128xf32>
    %13 = arith.mulf %11, %12 : vector<128x128xf32>
    %c0_8 = arith.constant 0 : index
    %c0_9 = arith.constant 0 : index
    %14 = vector.load %arg3[%c0_8, %c0_9] : memref<128x128xf32, #tpu.memory_space<vmem>>, vector<128x128xf32>
    tpu.vector_store %arg3[%c0_8, %c0_9], %13 {strides = array<i32>} : memref<128x128xf32, #tpu.memory_space<vmem>>, vector<128x128xf32>,
    return
  }
  func.func @transform_0(%arg0: i32) -> (i32, i32) {
    %c0_i32 = arith.constant 0 : i32
    %c0_i32_0 = arith.constant 0 : i32
    %c0_i32_1 = arith.constant 0 : i32
    return %c0_i32, %c0_i32_0 : i32, i32
  }
  func.func @transform_1(%arg0: i32) -> (i32, i32) {
    %c0_i32 = arith.constant 0 : i32
    %c0_i32_0 = arith.constant 0 : i32
    return %c0_i32, %arg0 : i32, i32
  }
  func.func @transform_2(%arg0: i32) -> (i32, i32) {
    %c0_i32 = arith.constant 0 : i32
    %c0_i32_0 = arith.constant 0 : i32
    return %c0_i32, %arg0 : i32, i32
  }
}

module attributes {stable_mosaic.version = 11 : i64} {
  func.func @_mgdcf_resident_kernel(%arg0: i32, %arg1: memref<128x128xf32, #tpu.memory_space<vmem>>, %arg2: memref<128x128xf32, #tpu.memory_space<vmem>>, %arg3: memref<128x128xf32, #tpu.memory_space<vmem>>) attributes {dimension_semantics = [#tpu.dimension_semantics<parallel>], iteration_bounds = array<i64: 1>, scalar_prefetch = 0 : i64, scratch_operands = 0 : i64, tpu.core_type = #tpu.core_type<tc>, window_params = [{pipeline_mode = #tpu.pipeline_mode<synchronous>, transform_indices = @transform_0, window_bounds = array<i64: 128, 128>}, {transform_indices = @transform_1, window_bounds = array<i64: 128, 128>}, {transform_indices = @transform_2, window_bounds = array<i64: 128, 128>}]} {
    %c0 = arith.constant 0 : index
    %c0_0 = arith.constant 0 : index
    %0 = vector.load %arg1[%c0, %c0_0] : memref<128x128xf32, #tpu.memory_space<vmem>>, vector<128x128xf32>
    %c0_1 = arith.constant 0 : index
    %c0_2 = arith.constant 0 : index
    %1 = vector.load %arg2[%c0_1, %c0_2] : memref<128x128xf32, #tpu.memory_space<vmem>>, vector<128x128xf32>
    %cst = arith.constant 1.000000e-01 : f32
    %2 = vector.broadcast %cst : f32 to vector<128x128xf32>
    %3 = arith.mulf %1, %2 : vector<128x128xf32>
    %c0_i32 = arith.constant 0 : i32
    %cst_3 = arith.constant dense<0.000000e+00> : vector<128x128xf32>
    %4 = tpu.matmul %0, %1, %cst_3 {dimension_numbers = #tpu.dot_dimension_numbers<[1], [0], [0], [1], [0, 0, 1, 1], [], []>} : vector<128x128xf32>, vector<128x128xf32>, vector<128x128xf32> -> vector<128x128xf32>
    %5 = arith.addf %4, %3 : vector<128x128xf32>
    %c1_i32 = arith.constant 1 : i32
    %cst_4 = arith.constant dense<0.000000e+00> : vector<128x128xf32>
    %6 = tpu.matmul %0, %5, %cst_4 {dimension_numbers = #tpu.dot_dimension_numbers<[1], [0], [0], [1], [0, 0, 1, 1], [], []>} : vector<128x128xf32>, vector<128x128xf32>, vector<128x128xf32> -> vector<128x128xf32>
    %7 = arith.addf %6, %3 : vector<128x128xf32>
    %c2_i32 = arith.constant 2 : i32
    %cst_5 = arith.constant dense<0.000000e+00> : vector<128x128xf32>
    %8 = tpu.matmul %0, %7, %cst_5 {dimension_numbers = #tpu.dot_dimension_numbers<[1], [0], [0], [1], [0, 0, 1, 1], [], []>} : vector<128x128xf32>, vector<128x128xf32>, vector<128x128xf32> -> vector<128x128xf32>
    %9 = arith.addf %8, %3 : vector<128x128xf32>
    %c3_i32 = arith.constant 3 : i32
    %cst_6 = arith.constant dense<0.000000e+00> : vector<128x128xf32>
    %10 = tpu.matmul %0, %9, %cst_6 {dimension_numbers = #tpu.dot_dimension_numbers<[1], [0], [0], [1], [0, 0, 1, 1], [], []>} : vector<128x128xf32>, vector<128x128xf32>, vector<128x128xf32> -> vector<128x128xf32>
    %11 = arith.addf %10, %3 : vector<128x128xf32>
    %cst_7 = arith.constant 1.000000e+00 : f32
    %12 = vector.broadcast %cst_7 : f32 to vector<128x128xf32>
    %13 = arith.mulf %11, %12 : vector<128x128xf32>
    %c0_8 = arith.constant 0 : index
    %c0_9 = arith.constant 0 : index
    %14 = vector.load %arg3[%c0_8, %c0_9] : memref<128x128xf32, #tpu.memory_space<vmem>>, vector<128x128xf32>
    tpu.vector_store %arg3[%c0_8, %c0_9], %13 {strides = array<i32>} : memref<128x128xf32, #tpu.memory_space<vmem>>, vector<128x128xf32>,
    return
  }
  func.func @transform_0(%arg0: i32) -> (i32, i32) {
    %c0_i32 = arith.constant 0 : i32
    %c0_i32_0 = arith.constant 0 : i32
    %c0_i32_1 = arith.constant 0 : i32
    return %c0_i32, %c0_i32_0 : i32, i32
  }
  func.func @transform_1(%arg0: i32) -> (i32, i32) {
    %c0_i32 = arith.constant 0 : i32
    %c0_i32_0 = arith.constant 0 : i32
    return %c0_i32, %arg0 : i32, i32
  }
  func.func @transform_2(%arg0: i32) -> (i32, i32) {
    %c0_i32 = arith.constant 0 : i32
    %c0_i32_0 = arith.constant 0 : i32
    return %c0_i32, %arg0 : i32, i32
  }
}

</mosaic_0001>

<bundles_post_ra>
// kernel: tpu_custom_call.1
= control target key start
LH: loop header
LB: loop body
LE: loop exit
PB: predicated region body
PF: predicated region fallthrough
CT: control target
= control target key end

     0   :  { %7 = vsyncpa [#allocation3], 0  ;;  %s1580_s0 = inlined_call_operand.hbm [shape: f32[128,128], index: 0, kind: input, shape index: {}]   ;;  %s1581_s1 = inlined_call_operand.hbm [shape: f32[128,128], index: 1, kind: input, shape index: {}]   ;;  %s1582_s2 = inlined_call_operand.hbm [shape: f32[128,128], index: 2, kind: output, shape index: {}]  }
   0x1   :  { %8 = vsyncpa [#allocation6], 0 }
   0x2   :  { %9 = vsyncpa [#allocation4], 0  ;;  %s1259_s9 = smov [#allocation2]   ;;  %s1187_s13 = scalar_lea.hbm %s1580_s0, 2048 }
   0x3   :  { %s15_s10 = sshll.u32 %s1259_s9, 4  ;;  %p1188_p0 = scmp.ne.s32.totalorder %s1580_s0, %s1187_s13  ;;  %s16_s10 = int_to_ptr.vmem [resolvable:$true] %s15_s10 }
   0x4   :  { %p1191_p1 = scmp.lt.u32.totalorder %s1187_s13, %s1580_s0 }
   0x6   :  { %p1193_p2 = pnand %p1191_p1, %p1188_p0 }
   0x8   :  { %1196 = shalt.err (!%p1193_p2)
}
   0x9   :  { %s1197_s18 = scalar_lea.vmem %s16_s10, 2048  ;;  %p1202_p4 = scmp.lt.s32.totalorder %s16_s10, %s16_s10 }
   0xa   :  { %p1198_p3 = scmp.ne.s32.totalorder %s16_s10, %s1197_s18  ;;  %p1203_p5 = scmp.lt.s32.totalorder %s1197_s18, %s1197_s18 }
   0xc   :  { %p1204_p6 = por %p1203_p5, %p1202_p4 }
   0xe   :  { %p1205_p7 = pnand %p1204_p6, %p1198_p3 }
  0x10   :  { %1208 = shalt.err (!%p1205_p7)
}
  0x11   :  { %s1260_s19 = smov 128   ;;  %s1261_s20 = smov 8  }
  0x12   :  { %21 = dma.hbm_to_vmem [thread:$0]  %s1580_s0, 2048, %s16_s10, [#allocation3], %s1260_s19, %s1260_s19, %s1261_s20  }
  0x13   :  { %s1262_s23 = smov [#allocation5]   ;;  %s1209_s27 = scalar_lea.hbm %s1581_s1, 2048 }
  0x14   :  { %s27_s24 = sshll.u32 %s1262_s23, 4  ;;  %p1210_p8 = scmp.ne.s32.totalorder %s1581_s1, %s1209_s27  ;;  %s28_s24 = int_to_ptr.vmem [resolvable:$true] %s27_s24 }
  0x15   :  { %p1213_p9 = scmp.lt.u32.totalorder %s1209_s27, %s1581_s1 }
  0x17   :  { %p1215_p10 = pnand %p1213_p9, %p1210_p8 }
  0x19   :  { %1218 = shalt.err (!%p1215_p10)
}
  0x1a   :  { %s1219_s4 = scalar_lea.vmem %s28_s24, 2048  ;;  %p1224_p12 = scmp.lt.s32.totalorder %s28_s24, %s28_s24 }
  0x1b   :  { %p1220_p11 = scmp.ne.s32.totalorder %s28_s24, %s1219_s4  ;;  %p1225_p13 = scmp.lt.s32.totalorder %s1219_s4, %s1219_s4 }
  0x1d   :  { %p1226_p0 = por %p1225_p13, %p1224_p12 }
  0x1f   :  { %p1227_p1 = pnand %p1226_p0, %p1220_p11 }
  0x21   :  { %1230 = shalt.err (!%p1227_p1)
}
  0x22   :  { %33 = dma.hbm_to_vmem [thread:$0]  %s1581_s1, 2048, %s28_s24, [#allocation6], %s1260_s19, %s1260_s19, %s1261_s20  }
  0x23   :  { %1253 = dma.done.wait [#allocation3], 2048  }
  0x24   :  { %1254 = vsyncadd [#allocation3], 4294965248 }
  0x25   :  { %1255 = dma.done.wait [#allocation6], 2048  }
  0x26   :  { %1256 = vsyncadd [#allocation6], 4294965248  ;;  %v1309_v0 = vld [vmem:[#allocation5] sm:$0xff]  ;;  %v1311_v1 = vld [vmem:[#allocation5 + $0x8] sm:$0xff]  ;;  %s1263_s1 = smov [#allocation7]  }
  0x27   :  { %v1313_v2 = vld [vmem:[#allocation5 + $0x10] sm:$0xff]  ;;  %v1054_v3 = vpack.c.bf16 %v1311_v1, %v1309_v0  ;;  %v1317_v4 = vld [vmem:[#allocation5 + $0x18] sm:$0xff]  ;;  %v1321_v6 = vld [vmem:[#allocation5 + $0x20] sm:$0xff]  ;;  %v1408_v40 = vmul.f32 0.1, %v1311_v1  ;;  %s689_s6 = sshll.u32 %s1263_s1, 4  ;;  %s690_s6 = int_to_ptr.vmem [resolvable:$true] %s689_s6 }
  0x28   :  { %v1058_v5 = vpack.c.bf16 %v1317_v4, %v1313_v2  ;;  %v1323_v7 = vld [vmem:[#allocation5 + $0x28] sm:$0xff]  ;;  %v1327_v9 = vld [vmem:[#allocation5 + $0x30] sm:$0xff]  ;;  %v1329_v10 = vld [vmem:[#allocation5 + $0x38] sm:$0xff]  ;;  %v1411_v41 = vmul.f32 0.1, %v1309_v0  ;;  %s1231_s7 = scalar_lea.vmem %s690_s6, 2048  ;;  %p1236_p3 = scmp.lt.s32.totalorder %s690_s6, %s690_s6 }
  0x29   :  { %1055 = vmatprep.subr.bf16.mxu0 %v1054_v3  ;;  %v1062_v8 = vpack.c.bf16 %v1323_v7, %v1321_v6  ;;  %v1331_v11 = vld [vmem:[#allocation2] sm:$0xff]  ;;  %v1066_v12 = vpack.c.bf16 %v1329_v10, %v1327_v9  ;;  %v1339_v14 = vld [vmem:[#allocation5 + $0x48] sm:$0xff]  ;;  %v1343_v16 = vld [vmem:[#allocation5 + $0x50] sm:$0xff]  ;;  %v1414_v43 = vmul.f32 0.1, %v1317_v4  ;;  %p1232_p2 = scmp.ne.s32.totalorder %s690_s6, %s1231_s7  ;;  %p1237_p4 = scmp.lt.s32.totalorder %s1231_s7, %s1231_s7 }
  0x2a   :  { %1057 = vmatpush3.bf16.msra.mxu0 %v1054_v3  ;;  %862 = vmatprep.mubr.f32.mxu0 %v1331_v11  ;;  %v1337_v13 = vld [vmem:[#allocation5 + $0x40] sm:$0xff]  ;;  %v1345_v17 = vld [vmem:[#allocation5 + $0x58] sm:$0xff]  ;;  %v1351_v20 = vld [vmem:[#allocation5 + $0x68] sm:$0xff]  ;;  %v1418_v46 = vmul.f32 0.1, %v1313_v2 }
  0x2b   :  { %1059 = vmatprep.subr.bf16.mxu0 %v1058_v5  ;;  %918 = vmatprep.mubr.f32.mxu1 %v1331_v11  ;;  %v1070_v15 = vpack.c.bf16 %v1339_v14, %v1337_v13  ;;  %v1074_v18 = vpack.c.bf16 %v1345_v17, %v1343_v16  ;;  %v1349_v19 = vld [vmem:[#allocation5 + $0x60] sm:$0xff]  ;;  %v1355_v22 = vld [vmem:[#allocation5 + $0x70] sm:$0xff]  ;;  %v1357_v23 = vld [vmem:[#allocation5 + $0x78] sm:$0xff]  ;;  %v1422_v50 = vmul.f32 0.1, %v1323_v7  ;;  %p1238_p5 = por %p1237_p4, %p1236_p3 }
  0x2c   :  { %v1078_v21 = vpack.c.bf16 %v1351_v20, %v1349_v19  ;;  %v1082_v24 = vpack.c.bf16 %v1357_v23, %v1355_v22  ;;  %v1361_v25 = vld [vmem:[#allocation2 + $0x8] sm:$0xff]  ;;  %v1363_v26 = vld [vmem:[#allocation2 + $0x10] sm:$0xff]  ;;  %v1367_v27 = vld [vmem:[#allocation2 + $0x18] sm:$0xff]  ;;  %v1426_v53 = vmul.f32 0.1, %v1321_v6 }
  0x2d   :  { %v1369_v28 = vld [vmem:[#allocation2 + $0x20] sm:$0xff]  ;;  %v1373_v29 = vld [vmem:[#allocation2 + $0x28] sm:$0xff]  ;;  %v1375_v30 = vld [vmem:[#allocation2 + $0x30] sm:$0xff]  ;;  %v1430_v57 = vmul.f32 0.1, %v1329_v10  ;;  %p1239_p6 = pnand %p1238_p5, %p1232_p2 }
  0x2e   :  { %1061 = vmatpush3.bf16.msra.mxu0 %v1058_v5  ;;  %v1379_v31 = vld [vmem:[#allocation2 + $0x38] sm:$0xff]  ;;  %v1381_v32 = vld [vmem:[#allocation2 + $0x40] sm:$0xff]  ;;  %v1385_v33 = vld [vmem:[#allocation2 + $0x48] sm:$0xff]  ;;  %v1434_v60 = vmul.f32 0.1, %v1327_v9 }
  0x2f   :  { %1063 = vmatprep.subr.bf16.mxu0 %v1062_v8  ;;  %v1387_v34 = vld [vmem:[#allocation2 + $0x50] sm:$0xff]  ;;  %v1391_v35 = vld [vmem:[#allocation2 + $0x58] sm:$0xff]  ;;  %v1393_v36 = vld [vmem:[#allocation2 + $0x60] sm:$0xff]  ;;  %v1438_v0 = vmul.f32 0.1, %v1339_v14 }
  0x30   :  { %v1397_v37 = vld [vmem:[#allocation2 + $0x68] sm:$0xff]  ;;  %v1399_v38 = vld [vmem:[#allocation2 + $0x70] sm:$0xff]  ;;  %v1403_v39 = vld [vmem:[#allocation2 + $0x78] sm:$0xff]  ;;  %v1442_v3 = vmul.f32 0.1, %v1337_v13 }
  0x31   :  { %v1446_v7 = vmul.f32 0.1, %v1345_v17  ;;  %v1450_v10 = vmul.f32 0.1, %v1343_v16  ;;  %v1458_v17 = vmul.f32 0.1, %v1349_v19 }
  0x32   :  { %1065 = vmatpush3.bf16.msra.mxu0 %v1062_v8 }
  0x33   :  { %1067 = vmatprep.subr.bf16.mxu0 %v1066_v12 }
  0x36   :  { %1069 = vmatpush3.bf16.msra.mxu0 %v1066_v12 }
  0x37   :  { %1071 = vmatprep.subr.bf16.mxu0 %v1070_v15 }
  0x3a   :  { %1073 = vmatpush3.bf16.msra.mxu0 %v1070_v15  ;;  %v1454_v15 = vmul.f32 0.1, %v1351_v20  ;;  %v1466_v20 = vmul.f32 0.1, %v1355_v22 }
  0x3b   :  { %1075 = vmatprep.subr.bf16.mxu0 %v1074_v18 }
  0x3e   :  { %1077 = vmatpush3.bf16.msra.mxu0 %v1074_v18 }
  0x3f   :  { %1079 = vmatprep.subr.bf16.mxu0 %v1078_v21 }
  0x42   :  { %1081 = vmatpush3.bf16.msra.mxu0 %v1078_v21 }
  0x43   :  { %1083 = vmatprep.subr.bf16.mxu0 %v1082_v24 }
  0x46   :  { %1085 = vmatpush3.bf16.msra.mxu0 %v1082_v24 }
  0x49   :  { %863 = vmatmul.mubr.f32.vlgmr.msra.gmra.mrb[0].mxu0 %v1361_v25 }
  0x4a   :  { %865 = vmatprep.mubr.f32.mxu0 %v1363_v26 }
  0x4d   :  { %866 = vmatmul.mubr.f32.gmra.mrb[2].mxu0 %v1367_v27 }
  0x4e   :  { %868 = vmatprep.mubr.f32.mxu0 %v1369_v28 }
  0x51   :  { %869 = vmatmul.mubr.f32.gmra.mrb[4].mxu0 %v1373_v29 }
  0x52   :  { %871 = vmatprep.mubr.f32.mxu0 %v1375_v30 }
  0x55   :  { %872 = vmatmul.mubr.f32.gmra.mrb[6].mxu0 %v1379_v31 }
  0x56   :  { %874 = vmatprep.mubr.f32.mxu0 %v1381_v32 }
  0x59   :  { %875 = vmatmul.mubr.f32.gmra.mrb[8].mxu0 %v1385_v33 }
  0x5a   :  { %877 = vmatprep.mubr.f32.mxu0 %v1387_v34 }
  0x5d   :  { %878 = vmatmul.mubr.f32.gmra.mrb[10].mxu0 %v1391_v35 }
  0x5e   :  { %880 = vmatprep.mubr.f32.mxu0 %v1393_v36 }
  0x61   :  { %881 = vmatmul.mubr.f32.gmra.mrb[12].mxu0 %v1397_v37 }
  0x62   :  { %883 = vmatprep.mubr.f32.mxu0 %v1399_v38 }
  0x65   :  { %884 = vmatmul.mubr.f32.gmra.mrb[14].mxu0 %v1403_v39 }
  0x66   :  { %974 = vmatprep.mubr.f32.mxu0 %v1331_v11 }
 0x11c   :  { %v864_v42 = vpop.f32.mrb[0].mxu0 }
 0x11d   :  { %v160_v44 = vadd.f32 %v864_v42, %v1408_v40  ;;  %v154_v45 = vpop.f32.mrb[1].mxu0 }
 0x11e   :  { %v155_v47 = vadd.f32 %v154_v45, %v1411_v41 }
 0x120   :  { %v867_v48 = vpop.f32.mrb[2].mxu0  ;;  %v1086_v49 = vpack.c.bf16 %v160_v44, %v155_v47  ;;  %v1462_v44 = vmul.f32 0.1, %v1357_v23 }
 0x121   :  { %v170_v51 = vadd.f32 %v867_v48, %v1414_v43  ;;  %v164_v52 = vpop.f32.mrb[3].mxu0 }
 0x122   :  { %v165_v54 = vadd.f32 %v164_v52, %v1418_v46  ;;  %1087 = vmatprep.subr.bf16.mxu1 %v1086_v49 }
 0x123   :  { %1089 = vmatpush3.bf16.msra.mxu1 %v1086_v49 }
 0x124   :  { %v1090_v55 = vpack.c.bf16 %v170_v51, %v165_v54  ;;  %v870_v56 = vpop.f32.mrb[4].mxu0 }
 0x125   :  { %v180_v58 = vadd.f32 %v870_v56, %v1422_v50  ;;  %v174_v59 = vpop.f32.mrb[5].mxu0 }
 0x126   :  { %v175_v61 = vadd.f32 %v174_v59, %v1426_v53  ;;  %1091 = vmatprep.subr.bf16.mxu1 %v1090_v55 }
 0x127   :  { %1093 = vmatpush3.bf16.msra.mxu1 %v1090_v55 }
 0x128   :  { %v1094_v62 = vpack.c.bf16 %v180_v58, %v175_v61  ;;  %v873_v63 = vpop.f32.mrb[6].mxu0 }
 0x129   :  { %v190_v1 = vadd.f32 %v873_v63, %v1430_v57  ;;  %v184_v2 = vpop.f32.mrb[7].mxu0 }
 0x12a   :  { %v185_v4 = vadd.f32 %v184_v2, %v1434_v60  ;;  %1095 = vmatprep.subr.bf16.mxu1 %v1094_v62 }
 0x12b   :  { %1097 = vmatpush3.bf16.msra.mxu1 %v1094_v62 }
 0x12c   :  { %v1098_v5 = vpack.c.bf16 %v190_v1, %v185_v4  ;;  %v876_v6 = vpop.f32.mrb[8].mxu0 }
 0x12d   :  { %v200_v8 = vadd.f32 %v876_v6, %v1438_v0  ;;  %v194_v9 = vpop.f32.mrb[9].mxu0 }
 0x12e   :  { %v195_v12 = vadd.f32 %v194_v9, %v1442_v3  ;;  %1099 = vmatprep.subr.bf16.mxu1 %v1098_v5 }
 0x12f   :  { %1101 = vmatpush3.bf16.msra.mxu1 %v1098_v5 }
 0x130   :  { %v1102_v13 = vpack.c.bf16 %v200_v8, %v195_v12  ;;  %v879_v14 = vpop.f32.mrb[10].mxu0 }
 0x131   :  { %v210_v18 = vadd.f32 %v879_v14, %v1446_v7  ;;  %v204_v21 = vpop.f32.mrb[11].mxu0 }
 0x132   :  { %v205_v24 = vadd.f32 %v204_v21, %v1450_v10  ;;  %1103 = vmatprep.subr.bf16.mxu1 %v1102_v13 }
 0x133   :  { %1105 = vmatpush3.bf16.msra.mxu1 %v1102_v13 }
 0x134   :  { %v1106_v16 = vpack.c.bf16 %v210_v18, %v205_v24  ;;  %v882_v42 = vpop.f32.mrb[12].mxu0 }
 0x135   :  { %v220_v45 = vadd.f32 %v882_v42, %v1454_v15  ;;  %v214_v47 = vpop.f32.mrb[13].mxu0 }
 0x136   :  { %v215_v48 = vadd.f32 %v214_v47, %v1458_v17  ;;  %1107 = vmatprep.subr.bf16.mxu1 %v1106_v16 }
 0x137   :  { %1109 = vmatpush3.bf16.msra.mxu1 %v1106_v16 }
 0x138   :  { %v1110_v19 = vpack.c.bf16 %v220_v45, %v215_v48  ;;  %v885_v49 = vpop.f32.mrb[14].mxu0 }
 0x139   :  { %v230_v51 = vadd.f32 %v885_v49, %v1462_v44  ;;  %v224_v52 = vpop.f32.mrb[15].mxu0 }
 0x13a   :  { %v225_v54 = vadd.f32 %v224_v52, %v1466_v20  ;;  %1111 = vmatprep.subr.bf16.mxu1 %v1110_v19 }
 0x13b   :  { %1113 = vmatpush3.bf16.msra.mxu1 %v1110_v19 }
 0x13c   :  { %v1114_v23 = vpack.c.bf16 %v230_v51, %v225_v54 }
 0x13e   :  { %1115 = vmatprep.subr.bf16.mxu1 %v1114_v23 }
 0x13f   :  { %1117 = vmatpush3.bf16.msra.mxu1 %v1114_v23 }
 0x142   :  { %919 = vmatmul.mubr.f32.vlgmr.msra.gmra.mrb[0].mxu1 %v1361_v25 }
 0x143   :  { %921 = vmatprep.mubr.f32.mxu1 %v1363_v26 }
 0x146   :  { %922 = vmatmul.mubr.f32.gmra.mrb[2].mxu1 %v1367_v27 }
 0x147   :  { %924 = vmatprep.mubr.f32.mxu1 %v1369_v28 }
 0x14a   :  { %925 = vmatmul.mubr.f32.gmra.mrb[4].mxu1 %v1373_v29 }
 0x14b   :  { %927 = vmatprep.mubr.f32.mxu1 %v1375_v30 }
 0x14e   :  { %928 = vmatmul.mubr.f32.gmra.mrb[6].mxu1 %v1379_v31 }
 0x14f   :  { %930 = vmatprep.mubr.f32.mxu1 %v1381_v32 }
 0x152   :  { %931 = vmatmul.mubr.f32.gmra.mrb[8].mxu1 %v1385_v33 }
 0x153   :  { %933 = vmatprep.mubr.f32.mxu1 %v1387_v34 }
 0x156   :  { %934 = vmatmul.mubr.f32.gmra.mrb[10].mxu1 %v1391_v35 }
 0x157   :  { %936 = vmatprep.mubr.f32.mxu1 %v1393_v36 }
 0x15a   :  { %937 = vmatmul.mubr.f32.gmra.mrb[12].mxu1 %v1397_v37 }
 0x15b   :  { %939 = vmatprep.mubr.f32.mxu1 %v1399_v38 }
 0x15e   :  { %940 = vmatmul.mubr.f32.gmra.mrb[14].mxu1 %v1403_v39 }
 0x15f   :  { %1030 = vmatprep.mubr.f32.mxu1 %v1331_v11 }
 0x215   :  { %v920_v22 = vpop.f32.mrb[0].mxu1 }
 0x216   :  { %v305_v55 = vadd.f32 %v920_v22, %v1408_v40  ;;  %v299_v56 = vpop.f32.mrb[1].mxu1 }
 0x217   :  { %v300_v58 = vadd.f32 %v299_v56, %v1411_v41 }
 0x219   :  { %v1118_v59 = vpack.c.bf16 %v305_v55, %v300_v58  ;;  %v923_v61 = vpop.f32.mrb[2].mxu1 }
 0x21a   :  { %v315_v62 = vadd.f32 %v923_v61, %v1414_v43  ;;  %v309_v63 = vpop.f32.mrb[3].mxu1 }
 0x21b   :  { %v310_v1 = vadd.f32 %v309_v63, %v1418_v46  ;;  %1119 = vmatprep.subr.bf16.mxu0 %v1118_v59 }
 0x21c   :  { %1121 = vmatpush3.bf16.msra.mxu0 %v1118_v59 }
 0x21d   :  { %v1122_v2 = vpack.c.bf16 %v315_v62, %v310_v1  ;;  %v926_v4 = vpop.f32.mrb[4].mxu1 }
 0x21e   :  { %v325_v5 = vadd.f32 %v926_v4, %v1422_v50  ;;  %v319_v11 = vpop.f32.mrb[5].mxu1 }
 0x21f   :  { %v320_v6 = vadd.f32 %v319_v11, %v1426_v53  ;;  %1123 = vmatprep.subr.bf16.mxu0 %v1122_v2 }
 0x220   :  { %1125 = vmatpush3.bf16.msra.mxu0 %v1122_v2 }
 0x221   :  { %v1126_v8 = vpack.c.bf16 %v325_v5, %v320_v6  ;;  %v929_v9 = vpop.f32.mrb[6].mxu1 }
 0x222   :  { %v335_v12 = vadd.f32 %v929_v9, %v1430_v57  ;;  %v329_v13 = vpop.f32.mrb[7].mxu1 }
 0x223   :  { %v330_v14 = vadd.f32 %v329_v13, %v1434_v60  ;;  %1127 = vmatprep.subr.bf16.mxu0 %v1126_v8 }
 0x224   :  { %1129 = vmatpush3.bf16.msra.mxu0 %v1126_v8 }
 0x225   :  { %v1130_v18 = vpack.c.bf16 %v335_v12, %v330_v14  ;;  %v932_v21 = vpop.f32.mrb[8].mxu1 }
 0x226   :  { %v345_v24 = vadd.f32 %v932_v21, %v1438_v0  ;;  %v339_v16 = vpop.f32.mrb[9].mxu1 }
 0x227   :  { %v340_v42 = vadd.f32 %v339_v16, %v1442_v3  ;;  %1131 = vmatprep.subr.bf16.mxu0 %v1130_v18 }
 0x228   :  { %1133 = vmatpush3.bf16.msra.mxu0 %v1130_v18 }
 0x229   :  { %v1134_v45 = vpack.c.bf16 %v345_v24, %v340_v42  ;;  %v935_v47 = vpop.f32.mrb[10].mxu1 }
 0x22a   :  { %v355_v48 = vadd.f32 %v935_v47, %v1446_v7  ;;  %v349_v19 = vpop.f32.mrb[11].mxu1 }
 0x22b   :  { %v350_v49 = vadd.f32 %v349_v19, %v1450_v10  ;;  %1135 = vmatprep.subr.bf16.mxu0 %v1134_v45 }
 0x22c   :  { %1137 = vmatpush3.bf16.msra.mxu0 %v1134_v45 }
 0x22d   :  { %v1138_v51 = vpack.c.bf16 %v355_v48, %v350_v49  ;;  %v938_v52 = vpop.f32.mrb[12].mxu1 }
 0x22e   :  { %v365_v54 = vadd.f32 %v938_v52, %v1454_v15  ;;  %v359_v23 = vpop.f32.mrb[13].mxu1 }
 0x22f   :  { %v360_v22 = vadd.f32 %v359_v23, %v1458_v17  ;;  %1139 = vmatprep.subr.bf16.mxu0 %v1138_v51 }
 0x230   :  { %1141 = vmatpush3.bf16.msra.mxu0 %v1138_v51 }
 0x231   :  { %v1142_v55 = vpack.c.bf16 %v365_v54, %v360_v22  ;;  %v941_v56 = vpop.f32.mrb[14].mxu1 }
 0x232   :  { %v375_v58 = vadd.f32 %v941_v56, %v1462_v44  ;;  %v369_v59 = vpop.f32.mrb[15].mxu1 }
 0x233   :  { %v370_v61 = vadd.f32 %v369_v59, %v1466_v20  ;;  %1143 = vmatprep.subr.bf16.mxu0 %v1142_v55 }
 0x234   :  { %1145 = vmatpush3.bf16.msra.mxu0 %v1142_v55 }
 0x235   :  { %v1146_v62 = vpack.c.bf16 %v375_v58, %v370_v61 }
 0x237   :  { %1147 = vmatprep.subr.bf16.mxu0 %v1146_v62 }
 0x238   :  { %1149 = vmatpush3.bf16.msra.mxu0 %v1146_v62 }
 0x23b   :  { %975 = vmatmul.mubr.f32.vlgmr.msra.gmra.mrb[16].mxu0 %v1361_v25 }
 0x23c   :  { %977 = vmatprep.mubr.f32.mxu0 %v1363_v26 }
 0x23f   :  { %978 = vmatmul.mubr.f32.gmra.mrb[18].mxu0 %v1367_v27 }
 0x240   :  { %980 = vmatprep.mubr.f32.mxu0 %v1369_v28 }
 0x243   :  { %981 = vmatmul.mubr.f32.gmra.mrb[20].mxu0 %v1373_v29 }
 0x244   :  { %983 = vmatprep.mubr.f32.mxu0 %v1375_v30 }
 0x247   :  { %984 = vmatmul.mubr.f32.gmra.mrb[22].mxu0 %v1379_v31 }
 0x248   :  { %986 = vmatprep.mubr.f32.mxu0 %v1381_v32 }
 0x24b   :  { %987 = vmatmul.mubr.f32.gmra.mrb[24].mxu0 %v1385_v33 }
 0x24c   :  { %989 = vmatprep.mubr.f32.mxu0 %v1387_v34 }
 0x24f   :  { %990 = vmatmul.mubr.f32.gmra.mrb[26].mxu0 %v1391_v35 }
 0x250   :  { %992 = vmatprep.mubr.f32.mxu0 %v1393_v36 }
 0x253   :  { %993 = vmatmul.mubr.f32.gmra.mrb[28].mxu0 %v1397_v37 }
 0x254   :  { %995 = vmatprep.mubr.f32.mxu0 %v1399_v38 }
 0x257   :  { %996 = vmatmul.mubr.f32.gmra.mrb[30].mxu0 %v1403_v39 }
 0x30e   :  { %v976_v63 = vpop.f32.mrb[16].mxu0 }
 0x30f   :  { %v450_v1 = vadd.f32 %v976_v63, %v1408_v40  ;;  %v444_v2 = vpop.f32.mrb[17].mxu0 }
 0x310   :  { %v445_v4 = vadd.f32 %v444_v2, %v1411_v41 }
 0x312   :  { %v1150_v5 = vpack.c.bf16 %v450_v1, %v445_v4  ;;  %v979_v11 = vpop.f32.mrb[18].mxu0 }
 0x313   :  { %v460_v6 = vadd.f32 %v979_v11, %v1414_v43  ;;  %v454_v8 = vpop.f32.mrb[19].mxu0 }
 0x314   :  { %v455_v9 = vadd.f32 %v454_v8, %v1418_v46  ;;  %1151 = vmatprep.subr.bf16.mxu1 %v1150_v5 }
 0x315   :  { %1153 = vmatpush3.bf16.msra.mxu1 %v1150_v5 }
 0x316   :  { %v1154_v12 = vpack.c.bf16 %v460_v6, %v455_v9  ;;  %v982_v13 = vpop.f32.mrb[20].mxu0 }
 0x317   :  { %v470_v14 = vadd.f32 %v982_v13, %v1422_v50  ;;  %v464_v18 = vpop.f32.mrb[21].mxu0 }
 0x318   :  { %v465_v21 = vadd.f32 %v464_v18, %v1426_v53  ;;  %1155 = vmatprep.subr.bf16.mxu1 %v1154_v12 }
 0x319   :  { %1157 = vmatpush3.bf16.msra.mxu1 %v1154_v12 }
 0x31a   :  { %v1158_v24 = vpack.c.bf16 %v470_v14, %v465_v21  ;;  %v985_v16 = vpop.f32.mrb[22].mxu0 }
 0x31b   :  { %v480_v42 = vadd.f32 %v985_v16, %v1430_v57  ;;  %v474_v45 = vpop.f32.mrb[23].mxu0 }
 0x31c   :  { %v475_v47 = vadd.f32 %v474_v45, %v1434_v60  ;;  %1159 = vmatprep.subr.bf16.mxu1 %v1158_v24 }
 0x31d   :  { %1161 = vmatpush3.bf16.msra.mxu1 %v1158_v24 }
 0x31e   :  { %v1162_v48 = vpack.c.bf16 %v480_v42, %v475_v47  ;;  %v988_v19 = vpop.f32.mrb[24].mxu0 }
 0x31f   :  { %v490_v49 = vadd.f32 %v988_v19, %v1438_v0  ;;  %v484_v51 = vpop.f32.mrb[25].mxu0 }
 0x320   :  { %v485_v52 = vadd.f32 %v484_v51, %v1442_v3  ;;  %1163 = vmatprep.subr.bf16.mxu1 %v1162_v48 }
 0x321   :  { %1165 = vmatpush3.bf16.msra.mxu1 %v1162_v48 }
 0x322   :  { %v1166_v54 = vpack.c.bf16 %v490_v49, %v485_v52  ;;  %v991_v23 = vpop.f32.mrb[26].mxu0 }
 0x323   :  { %v500_v22 = vadd.f32 %v991_v23, %v1446_v7  ;;  %v494_v55 = vpop.f32.mrb[27].mxu0 }
 0x324   :  { %v495_v56 = vadd.f32 %v494_v55, %v1450_v10  ;;  %1167 = vmatprep.subr.bf16.mxu1 %v1166_v54 }
 0x325   :  { %1169 = vmatpush3.bf16.msra.mxu1 %v1166_v54 }
 0x326   :  { %v1170_v58 = vpack.c.bf16 %v500_v22, %v495_v56  ;;  %v994_v59 = vpop.f32.mrb[28].mxu0 }
 0x327   :  { %v510_v61 = vadd.f32 %v994_v59, %v1454_v15  ;;  %v504_v62 = vpop.f32.mrb[29].mxu0 }
 0x328   :  { %v505_v63 = vadd.f32 %v504_v62, %v1458_v17  ;;  %1171 = vmatprep.subr.bf16.mxu1 %v1170_v58 }
 0x329   :  { %1173 = vmatpush3.bf16.msra.mxu1 %v1170_v58 }
 0x32a   :  { %v1174_v1 = vpack.c.bf16 %v510_v61, %v505_v63  ;;  %v997_v2 = vpop.f32.mrb[30].mxu0 }
 0x32b   :  { %v520_v4 = vadd.f32 %v997_v2, %v1462_v44  ;;  %v514_v5 = vpop.f32.mrb[31].mxu0 }
 0x32c   :  { %v515_v11 = vadd.f32 %v514_v5, %v1466_v20  ;;  %1175 = vmatprep.subr.bf16.mxu1 %v1174_v1 }
 0x32d   :  { %1177 = vmatpush3.bf16.msra.mxu1 %v1174_v1 }
 0x32e   :  { %v1178_v6 = vpack.c.bf16 %v520_v4, %v515_v11 }
 0x330   :  { %1179 = vmatprep.subr.bf16.mxu1 %v1178_v6 }
 0x331   :  { %1181 = vmatpush3.bf16.msra.mxu1 %v1178_v6 }
 0x334   :  { %1031 = vmatmul.mubr.f32.vlgmr.msra.gmra.mrb[16].mxu1 %v1361_v25 }
 0x335   :  { %1033 = vmatprep.mubr.f32.mxu1 %v1363_v26 }
 0x338   :  { %1034 = vmatmul.mubr.f32.gmra.mrb[18].mxu1 %v1367_v27 }
 0x339   :  { %1036 = vmatprep.mubr.f32.mxu1 %v1369_v28 }
 0x33c   :  { %1037 = vmatmul.mubr.f32.gmra.mrb[20].mxu1 %v1373_v29 }
 0x33d   :  { %1039 = vmatprep.mubr.f32.mxu1 %v1375_v30 }
 0x340   :  { %1040 = vmatmul.mubr.f32.gmra.mrb[22].mxu1 %v1379_v31 }
 0x341   :  { %1042 = vmatprep.mubr.f32.mxu1 %v1381_v32 }
 0x344   :  { %1043 = vmatmul.mubr.f32.gmra.mrb[24].mxu1 %v1385_v33 }
 0x345   :  { %1045 = vmatprep.mubr.f32.mxu1 %v1387_v34 }
 0x348   :  { %1046 = vmatmul.mubr.f32.gmra.mrb[26].mxu1 %v1391_v35 }
 0x349   :  { %1048 = vmatprep.mubr.f32.mxu1 %v1393_v36 }
 0x34c   :  { %1049 = vmatmul.mubr.f32.gmra.mrb[28].mxu1 %v1397_v37 }
 0x34d   :  { %1051 = vmatprep.mubr.f32.mxu1 %v1399_v38 }
 0x350   :  { %1052 = vmatmul.mubr.f32.gmra.mrb[30].mxu1 %v1403_v39 }
 0x407   :  { %v1032_v25 = vpop.f32.mrb[16].mxu1 }
 0x408   :  { %v595_v26 = vadd.f32 %v1032_v25, %v1408_v40  ;;  %v589_v27 = vpop.f32.mrb[17].mxu1 }
 0x409   :  { %v590_v28 = vadd.f32 %v589_v27, %v1411_v41 }
 0x40a   :  { %669 = vst [vmem:[#allocation7 + $0x8] sm:$0xff] %v595_v26 }
 0x40b   :  { %668 = vst [vmem:[#allocation7] sm:$0xff] %v590_v28  ;;  %v1035_v29 = vpop.f32.mrb[18].mxu1 }
 0x40c   :  { %v605_v30 = vadd.f32 %v1035_v29, %v1414_v43  ;;  %v599_v31 = vpop.f32.mrb[19].mxu1 }
 0x40d   :  { %v600_v32 = vadd.f32 %v599_v31, %v1418_v46 }
 0x40e   :  { %671 = vst [vmem:[#allocation7 + $0x18] sm:$0xff] %v605_v30 }
 0x40f   :  { %670 = vst [vmem:[#allocation7 + $0x10] sm:$0xff] %v600_v32  ;;  %v1038_v33 = vpop.f32.mrb[20].mxu1 }
 0x410   :  { %v615_v34 = vadd.f32 %v1038_v33, %v1422_v50  ;;  %v609_v35 = vpop.f32.mrb[21].mxu1 }
 0x411   :  { %v610_v36 = vadd.f32 %v609_v35, %v1426_v53 }
 0x412   :  { %673 = vst [vmem:[#allocation7 + $0x28] sm:$0xff] %v615_v34 }
 0x413   :  { %672 = vst [vmem:[#allocation7 + $0x20] sm:$0xff] %v610_v36  ;;  %v1041_v37 = vpop.f32.mrb[22].mxu1 }
 0x414   :  { %v625_v38 = vadd.f32 %v1041_v37, %v1430_v57  ;;  %v619_v39 = vpop.f32.mrb[23].mxu1 }
 0x415   :  { %v620_v40 = vadd.f32 %v619_v39, %v1434_v60 }
 0x416   :  { %675 = vst [vmem:[#allocation7 + $0x38] sm:$0xff] %v625_v38 }
 0x417   :  { %674 = vst [vmem:[#allocation7 + $0x30] sm:$0xff] %v620_v40  ;;  %v1044_v41 = vpop.f32.mrb[24].mxu1 }
 0x418   :  { %v635_v43 = vadd.f32 %v1044_v41, %v1438_v0  ;;  %v629_v46 = vpop.f32.mrb[25].mxu1 }
 0x419   :  { %v630_v8 = vadd.f32 %v629_v46, %v1442_v3 }
 0x41a   :  { %677 = vst [vmem:[#allocation7 + $0x48] sm:$0xff] %v635_v43 }
 0x41b   :  { %676 = vst [vmem:[#allocation7 + $0x40] sm:$0xff] %v630_v8  ;;  %v1047_v50 = vpop.f32.mrb[26].mxu1 }
 0x41c   :  { %v645_v53 = vadd.f32 %v1047_v50, %v1446_v7  ;;  %v639_v9 = vpop.f32.mrb[27].mxu1 }
 0x41d   :  { %v640_v12 = vadd.f32 %v639_v9, %v1450_v10 }
 0x41e   :  { %679 = vst [vmem:[#allocation7 + $0x58] sm:$0xff] %v645_v53 }
 0x41f   :  { %678 = vst [vmem:[#allocation7 + $0x50] sm:$0xff] %v640_v12  ;;  %v1050_v57 = vpop.f32.mrb[28].mxu1 }
 0x420   :  { %v655_v60 = vadd.f32 %v1050_v57, %v1454_v15  ;;  %v649_v13 = vpop.f32.mrb[29].mxu1 }
 0x421   :  { %v650_v14 = vadd.f32 %v649_v13, %v1458_v17 }
 0x422   :  { %681 = vst [vmem:[#allocation7 + $0x68] sm:$0xff] %v655_v60 }
 0x423   :  { %680 = vst [vmem:[#allocation7 + $0x60] sm:$0xff] %v650_v14  ;;  %v1053_v0 = vpop.f32.mrb[30].mxu1 }
 0x424   :  { %v665_v3 = vadd.f32 %v1053_v0, %v1462_v44  ;;  %v659_v18 = vpop.f32.mrb[31].mxu1 }
 0x425   :  { %v660_v7 = vadd.f32 %v659_v18, %v1466_v20 }
 0x426   :  { %683 = vst [vmem:[#allocation7 + $0x78] sm:$0xff] %v665_v3 }
 0x427   :  { %682 = vst [vmem:[#allocation7 + $0x70] sm:$0xff] %v660_v7 }
 0x428   :  { %1242 = shalt.err (!%p1239_p6)
}
 0x429   :  { %s1243_s10 = scalar_lea.hbm %s1582_s2, 2048 }
 0x42a   :  { %p1244_p7 = scmp.ne.s32.totalorder %s1582_s2, %s1243_s10  ;;  %p1247_p8 = scmp.lt.u32.totalorder %s1243_s10, %s1582_s2 }
 0x42c   :  { %p1249_p9 = pnand %p1247_p8, %p1244_p7 }
 0x42e   :  { %1252 = shalt.err (!%p1249_p9)
}
 0x42f   :  { %695 = dma.vmem_to_hbm [thread:$0]  %s690_s6, 2048, %s1582_s2, [#allocation4], %s1260_s19, %s1260_s19, %s1261_s20  }
 0x430   :  { %1257 = dma.done.wait [#allocation4], 2048  }
 0x431   :  { %1258 = vsyncadd [#allocation4], 4294965248 }
 0x432   :  { %699 = vsyncpa [#allocation3], 1 }
 0x433   :  { %700 = vsyncpa [#allocation6], 1 }
 0x434   :  { %701 = vsyncpa [#allocation4], 1 }

// kernel: tpu_custom_call.1
= control target key start
LH: loop header
LB: loop body
LE: loop exit
PB: predicated region body
PF: predicated region fallthrough
CT: control target
= control target key end

     0   :  { %7 = vsyncpa [#allocation3], 0  ;;  %s1580_s0 = inlined_call_operand.hbm [shape: f32[128,128], index: 0, kind: input, shape index: {}]   ;;  %s1581_s1 = inlined_call_operand.hbm [shape: f32[128,128], index: 1, kind: input, shape index: {}]   ;;  %s1582_s2 = inlined_call_operand.hbm [shape: f32[128,128], index: 2, kind: output, shape index: {}]  }
   0x1   :  { %8 = vsyncpa [#allocation6], 0 }
   0x2   :  { %9 = vsyncpa [#allocation4], 0  ;;  %s1259_s9 = smov [#allocation2]   ;;  %s1187_s13 = scalar_lea.hbm %s1580_s0, 2048 }
   0x3   :  { %s15_s10 = sshll.u32 %s1259_s9, 4  ;;  %p1188_p0 = scmp.ne.s32.totalorder %s1580_s0, %s1187_s13  ;;  %s16_s10 = int_to_ptr.vmem [resolvable:$true] %s15_s10 }
   0x4   :  { %p1191_p1 = scmp.lt.u32.totalorder %s1187_s13, %s1580_s0 }
   0x6   :  { %p1193_p2 = pnand %p1191_p1, %p1188_p0 }
   0x8   :  { %1196 = shalt.err (!%p1193_p2)
}
   0x9   :  { %s1197_s18 = scalar_lea.vmem %s16_s10, 2048  ;;  %p1202_p4 = scmp.lt.s32.totalorder %s16_s10, %s16_s10 }
   0xa   :  { %p1198_p3 = scmp.ne.s32.totalorder %s16_s10, %s1197_s18  ;;  %p1203_p5 = scmp.lt.s32.totalorder %s1197_s18, %s1197_s18 }
   0xc   :  { %p1204_p6 = por %p1203_p5, %p1202_p4 }
   0xe   :  { %p1205_p7 = pnand %p1204_p6, %p1198_p3 }
  0x10   :  { %1208 = shalt.err (!%p1205_p7)
}
  0x11   :  { %s1260_s19 = smov 128   ;;  %s1261_s20 = smov 8  }
  0x12   :  { %21 = dma.hbm_to_vmem [thread:$0]  %s1580_s0, 2048, %s16_s10, [#allocation3], %s1260_s19, %s1260_s19, %s1261_s20  }
  0x13   :  { %s1262_s23 = smov [#allocation5]   ;;  %s1209_s27 = scalar_lea.hbm %s1581_s1, 2048 }
  0x14   :  { %s27_s24 = sshll.u32 %s1262_s23, 4  ;;  %p1210_p8 = scmp.ne.s32.totalorder %s1581_s1, %s1209_s27  ;;  %s28_s24 = int_to_ptr.vmem [resolvable:$true] %s27_s24 }
  0x15   :  { %p1213_p9 = scmp.lt.u32.totalorder %s1209_s27, %s1581_s1 }
  0x17   :  { %p1215_p10 = pnand %p1213_p9, %p1210_p8 }
  0x19   :  { %1218 = shalt.err (!%p1215_p10)
}
  0x1a   :  { %s1219_s4 = scalar_lea.vmem %s28_s24, 2048  ;;  %p1224_p12 = scmp.lt.s32.totalorder %s28_s24, %s28_s24 }
  0x1b   :  { %p1220_p11 = scmp.ne.s32.totalorder %s28_s24, %s1219_s4  ;;  %p1225_p13 = scmp.lt.s32.totalorder %s1219_s4, %s1219_s4 }
  0x1d   :  { %p1226_p0 = por %p1225_p13, %p1224_p12 }
  0x1f   :  { %p1227_p1 = pnand %p1226_p0, %p1220_p11 }
  0x21   :  { %1230 = shalt.err (!%p1227_p1)
}
  0x22   :  { %33 = dma.hbm_to_vmem [thread:$0]  %s1581_s1, 2048, %s28_s24, [#allocation6], %s1260_s19, %s1260_s19, %s1261_s20  }
  0x23   :  { %1253 = dma.done.wait [#allocation3], 2048  }
  0x24   :  { %1254 = vsyncadd [#allocation3], 4294965248 }
  0x25   :  { %1255 = dma.done.wait [#allocation6], 2048  }
  0x26   :  { %1256 = vsyncadd [#allocation6], 4294965248  ;;  %v1309_v0 = vld [vmem:[#allocation5] sm:$0xff]  ;;  %v1311_v1 = vld [vmem:[#allocation5 + $0x8] sm:$0xff]  ;;  %s1263_s1 = smov [#allocation7]  }
  0x27   :  { %v1313_v2 = vld [vmem:[#allocation5 + $0x10] sm:$0xff]  ;;  %v1054_v3 = vpack.c.bf16 %v1311_v1, %v1309_v0  ;;  %v1317_v4 = vld [vmem:[#allocation5 + $0x18] sm:$0xff]  ;;  %v1321_v6 = vld [vmem:[#allocation5 + $0x20] sm:$0xff]  ;;  %v1408_v40 = vmul.f32 0.1, %v1311_v1  ;;  %s689_s6 = sshll.u32 %s1263_s1, 4  ;;  %s690_s6 = int_to_ptr.vmem [resolvable:$true] %s689_s6 }
  0x28   :  { %v1058_v5 = vpack.c.bf16 %v1317_v4, %v1313_v2  ;;  %v1323_v7 = vld [vmem:[#allocation5 + $0x28] sm:$0xff]  ;;  %v1327_v9 = vld [vmem:[#allocation5 + $0x30] sm:$0xff]  ;;  %v1329_v10 = vld [vmem:[#allocation5 + $0x38] sm:$0xff]  ;;  %v1411_v41 = vmul.f32 0.1, %v1309_v0  ;;  %s1231_s7 = scalar_lea.vmem %s690_s6, 2048  ;;  %p1236_p3 = scmp.lt.s32.totalorder %s690_s6, %s690_s6 }
  0x29   :  { %1055 = vmatprep.subr.bf16.mxu0 %v1054_v3  ;;  %v1062_v8 = vpack.c.bf16 %v1323_v7, %v1321_v6  ;;  %v1331_v11 = vld [vmem:[#allocation2] sm:$0xff]  ;;  %v1066_v12 = vpack.c.bf16 %v1329_v10, %v1327_v9  ;;  %v1339_v14 = vld [vmem:[#allocation5 + $0x48] sm:$0xff]  ;;  %v1343_v16 = vld [vmem:[#allocation5 + $0x50] sm:$0xff]  ;;  %v1414_v43 = vmul.f32 0.1, %v1317_v4  ;;  %p1232_p2 = scmp.ne.s32.totalorder %s690_s6, %s1231_s7  ;;  %p1237_p4 = scmp.lt.s32.totalorder %s1231_s7, %s1231_s7 }
  0x2a   :  { %1057 = vmatpush3.bf16.msra.mxu0 %v1054_v3  ;;  %862 = vmatprep.mubr.f32.mxu0 %v1331_v11  ;;  %v1337_v13 = vld [vmem:[#allocation5 + $0x40] sm:$0xff]  ;;  %v1345_v17 = vld [vmem:[#allocation5 + $0x58] sm:$0xff]  ;;  %v1351_v20 = vld [vmem:[#allocation5 + $0x68] sm:$0xff]  ;;  %v1418_v46 = vmul.f32 0.1, %v1313_v2 }
  0x2b   :  { %1059 = vmatprep.subr.bf16.mxu0 %v1058_v5  ;;  %918 = vmatprep.mubr.f32.mxu1 %v1331_v11  ;;  %v1070_v15 = vpack.c.bf16 %v1339_v14, %v1337_v13  ;;  %v1074_v18 = vpack.c.bf16 %v1345_v17, %v1343_v16  ;;  %v1349_v19 = vld [vmem:[#allocation5 + $0x60] sm:$0xff]  ;;  %v1355_v22 = vld [vmem:[#allocation5 + $0x70] sm:$0xff]  ;;  %v1357_v23 = vld [vmem:[#allocation5 + $0x78] sm:$0xff]  ;;  %v1422_v50 = vmul.f32 0.1, %v1323_v7  ;;  %p1238_p5 = por %p1237_p4, %p1236_p3 }
  0x2c   :  { %v1078_v21 = vpack.c.bf16 %v1351_v20, %v1349_v19  ;;  %v1082_v24 = vpack.c.bf16 %v1357_v23, %v1355_v22  ;;  %v1361_v25 = vld [vmem:[#allocation2 + $0x8] sm:$0xff]  ;;  %v1363_v26 = vld [vmem:[#allocation2 + $0x10] sm:$0xff]  ;;  %v1367_v27 = vld [vmem:[#allocation2 + $0x18] sm:$0xff]  ;;  %v1426_v53 = vmul.f32 0.1, %v1321_v6 }
  0x2d   :  { %v1369_v28 = vld [vmem:[#allocation2 + $0x20] sm:$0xff]  ;;  %v1373_v29 = vld [vmem:[#allocation2 + $0x28] sm:$0xff]  ;;  %v1375_v30 = vld [vmem:[#allocation2 + $0x30] sm:$0xff]  ;;  %v1430_v57 = vmul.f32 0.1, %v1329_v10  ;;  %p1239_p6 = pnand %p1238_p5, %p1232_p2 }
  0x2e   :  { %1061 = vmatpush3.bf16.msra.mxu0 %v1058_v5  ;;  %v1379_v31 = vld [vmem:[#allocation2 + $0x38] sm:$0xff]  ;;  %v1381_v32 = vld [vmem:[#allocation2 + $0x40] sm:$0xff]  ;;  %v1385_v33 = vld [vmem:[#allocation2 + $0x48] sm:$0xff]  ;;  %v1434_v60 = vmul.f32 0.1, %v1327_v9 }
  0x2f   :  { %1063 = vmatprep.subr.bf16.mxu0 %v1062_v8  ;;  %v1387_v34 = vld [vmem:[#allocation2 + $0x50] sm:$0xff]  ;;  %v1391_v35 = vld [vmem:[#allocation2 + $0x58] sm:$0xff]  ;;  %v1393_v36 = vld [vmem:[#allocation2 + $0x60] sm:$0xff]  ;;  %v1438_v0 = vmul.f32 0.1, %v1339_v14 }
  0x30   :  { %v1397_v37 = vld [vmem:[#allocation2 + $0x68] sm:$0xff]  ;;  %v1399_v38 = vld [vmem:[#allocation2 + $0x70] sm:$0xff]  ;;  %v1403_v39 = vld [vmem:[#allocation2 + $0x78] sm:$0xff]  ;;  %v1442_v3 = vmul.f32 0.1, %v1337_v13 }
  0x31   :  { %v1446_v7 = vmul.f32 0.1, %v1345_v17  ;;  %v1450_v10 = vmul.f32 0.1, %v1343_v16  ;;  %v1458_v17 = vmul.f32 0.1, %v1349_v19 }
  0x32   :  { %1065 = vmatpush3.bf16.msra.mxu0 %v1062_v8 }
  0x33   :  { %1067 = vmatprep.subr.bf16.mxu0 %v1066_v12 }
  0x36   :  { %1069 = vmatpush3.bf16.msra.mxu0 %v1066_v12 }
  0x37   :  { %1071 = vmatprep.subr.bf16.mxu0 %v1070_v15 }
  0x3a   :  { %1073 = vmatpush3.bf16.msra.mxu0 %v1070_v15  ;;  %v1454_v15 = vmul.f32 0.1, %v1351_v20  ;;  %v1466_v20 = vmul.f32 0.1, %v1355_v22 }
  0x3b   :  { %1075 = vmatprep.subr.bf16.mxu0 %v1074_v18 }
  0x3e   :  { %1077 = vmatpush3.bf16.msra.mxu0 %v1074_v18 }
  0x3f   :  { %1079 = vmatprep.subr.bf16.mxu0 %v1078_v21 }
  0x42   :  { %1081 = vmatpush3.bf16.msra.mxu0 %v1078_v21 }
  0x43   :  { %1083 = vmatprep.subr.bf16.mxu0 %v1082_v24 }
  0x46   :  { %1085 = vmatpush3.bf16.msra.mxu0 %v1082_v24 }
  0x49   :  { %863 = vmatmul.mubr.f32.vlgmr.msra.gmra.mrb[0].mxu0 %v1361_v25 }
  0x4a   :  { %865 = vmatprep.mubr.f32.mxu0 %v1363_v26 }
  0x4d   :  { %866 = vmatmul.mubr.f32.gmra.mrb[2].mxu0 %v1367_v27 }
  0x4e   :  { %868 = vmatprep.mubr.f32.mxu0 %v1369_v28 }
  0x51   :  { %869 = vmatmul.mubr.f32.gmra.mrb[4].mxu0 %v1373_v29 }
  0x52   :  { %871 = vmatprep.mubr.f32.mxu0 %v1375_v30 }
  0x55   :  { %872 = vmatmul.mubr.f32.gmra.mrb[6].mxu0 %v1379_v31 }
  0x56   :  { %874 = vmatprep.mubr.f32.mxu0 %v1381_v32 }
  0x59   :  { %875 = vmatmul.mubr.f32.gmra.mrb[8].mxu0 %v1385_v33 }
  0x5a   :  { %877 = vmatprep.mubr.f32.mxu0 %v1387_v34 }
  0x5d   :  { %878 = vmatmul.mubr.f32.gmra.mrb[10].mxu0 %v1391_v35 }
  0x5e   :  { %880 = vmatprep.mubr.f32.mxu0 %v1393_v36 }
  0x61   :  { %881 = vmatmul.mubr.f32.gmra.mrb[12].mxu0 %v1397_v37 }
  0x62   :  { %883 = vmatprep.mubr.f32.mxu0 %v1399_v38 }
  0x65   :  { %884 = vmatmul.mubr.f32.gmra.mrb[14].mxu0 %v1403_v39 }
  0x66   :  { %974 = vmatprep.mubr.f32.mxu0 %v1331_v11 }
 0x11c   :  { %v864_v42 = vpop.f32.mrb[0].mxu0 }
 0x11d   :  { %v160_v44 = vadd.f32 %v864_v42, %v1408_v40  ;;  %v154_v45 = vpop.f32.mrb[1].mxu0 }
 0x11e   :  { %v155_v47 = vadd.f32 %v154_v45, %v1411_v41 }
 0x120   :  { %v867_v48 = vpop.f32.mrb[2].mxu0  ;;  %v1086_v49 = vpack.c.bf16 %v160_v44, %v155_v47  ;;  %v1462_v44 = vmul.f32 0.1, %v1357_v23 }
 0x121   :  { %v170_v51 = vadd.f32 %v867_v48, %v1414_v43  ;;  %v164_v52 = vpop.f32.mrb[3].mxu0 }
 0x122   :  { %v165_v54 = vadd.f32 %v164_v52, %v1418_v46  ;;  %1087 = vmatprep.subr.bf16.mxu1 %v1086_v49 }
 0x123   :  { %1089 = vmatpush3.bf16.msra.mxu1 %v1086_v49 }
 0x124   :  { %v1090_v55 = vpack.c.bf16 %v170_v51, %v165_v54  ;;  %v870_v56 = vpop.f32.mrb[4].mxu0 }
 0x125   :  { %v180_v58 = vadd.f32 %v870_v56, %v1422_v50  ;;  %v174_v59 = vpop.f32.mrb[5].mxu0 }
 0x126   :  { %v175_v61 = vadd.f32 %v174_v59, %v1426_v53  ;;  %1091 = vmatprep.subr.bf16.mxu1 %v1090_v55 }
 0x127   :  { %1093 = vmatpush3.bf16.msra.mxu1 %v1090_v55 }
 0x128   :  { %v1094_v62 = vpack.c.bf16 %v180_v58, %v175_v61  ;;  %v873_v63 = vpop.f32.mrb[6].mxu0 }
 0x129   :  { %v190_v1 = vadd.f32 %v873_v63, %v1430_v57  ;;  %v184_v2 = vpop.f32.mrb[7].mxu0 }
 0x12a   :  { %v185_v4 = vadd.f32 %v184_v2, %v1434_v60  ;;  %1095 = vmatprep.subr.bf16.mxu1 %v1094_v62 }
 0x12b   :  { %1097 = vmatpush3.bf16.msra.mxu1 %v1094_v62 }
 0x12c   :  { %v1098_v5 = vpack.c.bf16 %v190_v1, %v185_v4  ;;  %v876_v6 = vpop.f32.mrb[8].mxu0 }
 0x12d   :  { %v200_v8 = vadd.f32 %v876_v6, %v1438_v0  ;;  %v194_v9 = vpop.f32.mrb[9].mxu0 }
 0x12e   :  { %v195_v12 = vadd.f32 %v194_v9, %v1442_v3  ;;  %1099 = vmatprep.subr.bf16.mxu1 %v1098_v5 }
 0x12f   :  { %1101 = vmatpush3.bf16.msra.mxu1 %v1098_v5 }
 0x130   :  { %v1102_v13 = vpack.c.bf16 %v200_v8, %v195_v12  ;;  %v879_v14 = vpop.f32.mrb[10].mxu0 }
 0x131   :  { %v210_v18 = vadd.f32 %v879_v14, %v1446_v7  ;;  %v204_v21 = vpop.f32.mrb[11].mxu0 }
 0x132   :  { %v205_v24 = vadd.f32 %v204_v21, %v1450_v10  ;;  %1103 = vmatprep.subr.bf16.mxu1 %v1102_v13 }
 0x133   :  { %1105 = vmatpush3.bf16.msra.mxu1 %v1102_v13 }
 0x134   :  { %v1106_v16 = vpack.c.bf16 %v210_v18, %v205_v24  ;;  %v882_v42 = vpop.f32.mrb[12].mxu0 }
 0x135   :  { %v220_v45 = vadd.f32 %v882_v42, %v1454_v15  ;;  %v214_v47 = vpop.f32.mrb[13].mxu0 }
 0x136   :  { %v215_v48 = vadd.f32 %v214_v47, %v1458_v17  ;;  %1107 = vmatprep.subr.bf16.mxu1 %v1106_v16 }
 0x137   :  { %1109 = vmatpush3.bf16.msra.mxu1 %v1106_v16 }
 0x138   :  { %v1110_v19 = vpack.c.bf16 %v220_v45, %v215_v48  ;;  %v885_v49 = vpop.f32.mrb[14].mxu0 }
 0x139   :  { %v230_v51 = vadd.f32 %v885_v49, %v1462_v44  ;;  %v224_v52 = vpop.f32.mrb[15].mxu0 }
 0x13a   :  { %v225_v54 = vadd.f32 %v224_v52, %v1466_v20  ;;  %1111 = vmatprep.subr.bf16.mxu1 %v1110_v19 }
 0x13b   :  { %1113 = vmatpush3.bf16.msra.mxu1 %v1110_v19 }
 0x13c   :  { %v1114_v23 = vpack.c.bf16 %v230_v51, %v225_v54 }
 0x13e   :  { %1115 = vmatprep.subr.bf16.mxu1 %v1114_v23 }
 0x13f   :  { %1117 = vmatpush3.bf16.msra.mxu1 %v1114_v23 }
 0x142   :  { %919 = vmatmul.mubr.f32.vlgmr.msra.gmra.mrb[0].mxu1 %v1361_v25 }
 0x143   :  { %921 = vmatprep.mubr.f32.mxu1 %v1363_v26 }
 0x146   :  { %922 = vmatmul.mubr.f32.gmra.mrb[2].mxu1 %v1367_v27 }
 0x147   :  { %924 = vmatprep.mubr.f32.mxu1 %v1369_v28 }
 0x14a   :  { %925 = vmatmul.mubr.f32.gmra.mrb[4].mxu1 %v1373_v29 }
 0x14b   :  { %927 = vmatprep.mubr.f32.mxu1 %v1375_v30 }
 0x14e   :  { %928 = vmatmul.mubr.f32.gmra.mrb[6].mxu1 %v1379_v31 }
 0x14f   :  { %930 = vmatprep.mubr.f32.mxu1 %v1381_v32 }
 0x152   :  { %931 = vmatmul.mubr.f32.gmra.mrb[8].mxu1 %v1385_v33 }
 0x153   :  { %933 = vmatprep.mubr.f32.mxu1 %v1387_v34 }
 0x156   :  { %934 = vmatmul.mubr.f32.gmra.mrb[10].mxu1 %v1391_v35 }
 0x157   :  { %936 = vmatprep.mubr.f32.mxu1 %v1393_v36 }
 0x15a   :  { %937 = vmatmul.mubr.f32.gmra.mrb[12].mxu1 %v1397_v37 }
 0x15b   :  { %939 = vmatprep.mubr.f32.mxu1 %v1399_v38 }
 0x15e   :  { %940 = vmatmul.mubr.f32.gmra.mrb[14].mxu1 %v1403_v39 }
 0x15f   :  { %1030 = vmatprep.mubr.f32.mxu1 %v1331_v11 }
 0x215   :  { %v920_v22 = vpop.f32.mrb[0].mxu1 }
 0x216   :  { %v305_v55 = vadd.f32 %v920_v22, %v1408_v40  ;;  %v299_v56 = vpop.f32.mrb[1].mxu1 }
 0x217   :  { %v300_v58 = vadd.f32 %v299_v56, %v1411_v41 }
 0x219   :  { %v1118_v59 = vpack.c.bf16 %v305_v55, %v300_v58  ;;  %v923_v61 = vpop.f32.mrb[2].mxu1 }
 0x21a   :  { %v315_v62 = vadd.f32 %v923_v61, %v1414_v43  ;;  %v309_v63 = vpop.f32.mrb[3].mxu1 }
 0x21b   :  { %v310_v1 = vadd.f32 %v309_v63, %v1418_v46  ;;  %1119 = vmatprep.subr.bf16.mxu0 %v1118_v59 }
 0x21c   :  { %1121 = vmatpush3.bf16.msra.mxu0 %v1118_v59 }
 0x21d   :  { %v1122_v2 = vpack.c.bf16 %v315_v62, %v310_v1  ;;  %v926_v4 = vpop.f32.mrb[4].mxu1 }
 0x21e   :  { %v325_v5 = vadd.f32 %v926_v4, %v1422_v50  ;;  %v319_v11 = vpop.f32.mrb[5].mxu1 }
 0x21f   :  { %v320_v6 = vadd.f32 %v319_v11, %v1426_v53  ;;  %1123 = vmatprep.subr.bf16.mxu0 %v1122_v2 }
 0x220   :  { %1125 = vmatpush3.bf16.msra.mxu0 %v1122_v2 }
 0x221   :  { %v1126_v8 = vpack.c.bf16 %v325_v5, %v320_v6  ;;  %v929_v9 = vpop.f32.mrb[6].mxu1 }
 0x222   :  { %v335_v12 = vadd.f32 %v929_v9, %v1430_v57  ;;  %v329_v13 = vpop.f32.mrb[7].mxu1 }
 0x223   :  { %v330_v14 = vadd.f32 %v329_v13, %v1434_v60  ;;  %1127 = vmatprep.subr.bf16.mxu0 %v1126_v8 }
 0x224   :  { %1129 = vmatpush3.bf16.msra.mxu0 %v1126_v8 }
 0x225   :  { %v1130_v18 = vpack.c.bf16 %v335_v12, %v330_v14  ;;  %v932_v21 = vpop.f32.mrb[8].mxu1 }
 0x226   :  { %v345_v24 = vadd.f32 %v932_v21, %v1438_v0  ;;  %v339_v16 = vpop.f32.mrb[9].mxu1 }
 0x227   :  { %v340_v42 = vadd.f32 %v339_v16, %v1442_v3  ;;  %1131 = vmatprep.subr.bf16.mxu0 %v1130_v18 }
 0x228   :  { %1133 = vmatpush3.bf16.msra.mxu0 %v1130_v18 }
 0x229   :  { %v1134_v45 = vpack.c.bf16 %v345_v24, %v340_v42  ;;  %v935_v47 = vpop.f32.mrb[10].mxu1 }
 0x22a   :  { %v355_v48 = vadd.f32 %v935_v47, %v1446_v7  ;;  %v349_v19 = vpop.f32.mrb[11].mxu1 }
 0x22b   :  { %v350_v49 = vadd.f32 %v349_v19, %v1450_v10  ;;  %1135 = vmatprep.subr.bf16.mxu0 %v1134_v45 }
 0x22c   :  { %1137 = vmatpush3.bf16.msra.mxu0 %v1134_v45 }
 0x22d   :  { %v1138_v51 = vpack.c.bf16 %v355_v48, %v350_v49  ;;  %v938_v52 = vpop.f32.mrb[12].mxu1 }
 0x22e   :  { %v365_v54 = vadd.f32 %v938_v52, %v1454_v15  ;;  %v359_v23 = vpop.f32.mrb[13].mxu1 }
 0x22f   :  { %v360_v22 = vadd.f32 %v359_v23, %v1458_v17  ;;  %1139 = vmatprep.subr.bf16.mxu0 %v1138_v51 }
 0x230   :  { %1141 = vmatpush3.bf16.msra.mxu0 %v1138_v51 }
 0x231   :  { %v1142_v55 = vpack.c.bf16 %v365_v54, %v360_v22  ;;  %v941_v56 = vpop.f32.mrb[14].mxu1 }
 0x232   :  { %v375_v58 = vadd.f32 %v941_v56, %v1462_v44  ;;  %v369_v59 = vpop.f32.mrb[15].mxu1 }
 0x233   :  { %v370_v61 = vadd.f32 %v369_v59, %v1466_v20  ;;  %1143 = vmatprep.subr.bf16.mxu0 %v1142_v55 }
 0x234   :  { %1145 = vmatpush3.bf16.msra.mxu0 %v1142_v55 }
 0x235   :  { %v1146_v62 = vpack.c.bf16 %v375_v58, %v370_v61 }
 0x237   :  { %1147 = vmatprep.subr.bf16.mxu0 %v1146_v62 }
 0x238   :  { %1149 = vmatpush3.bf16.msra.mxu0 %v1146_v62 }
 0x23b   :  { %975 = vmatmul.mubr.f32.vlgmr.msra.gmra.mrb[16].mxu0 %v1361_v25 }
 0x23c   :  { %977 = vmatprep.mubr.f32.mxu0 %v1363_v26 }
 0x23f   :  { %978 = vmatmul.mubr.f32.gmra.mrb[18].mxu0 %v1367_v27 }
 0x240   :  { %980 = vmatprep.mubr.f32.mxu0 %v1369_v28 }
 0x243   :  { %981 = vmatmul.mubr.f32.gmra.mrb[20].mxu0 %v1373_v29 }
 0x244   :  { %983 = vmatprep.mubr.f32.mxu0 %v1375_v30 }
 0x247   :  { %984 = vmatmul.mubr.f32.gmra.mrb[22].mxu0 %v1379_v31 }
 0x248   :  { %986 = vmatprep.mubr.f32.mxu0 %v1381_v32 }
 0x24b   :  { %987 = vmatmul.mubr.f32.gmra.mrb[24].mxu0 %v1385_v33 }
 0x24c   :  { %989 = vmatprep.mubr.f32.mxu0 %v1387_v34 }
 0x24f   :  { %990 = vmatmul.mubr.f32.gmra.mrb[26].mxu0 %v1391_v35 }
 0x250   :  { %992 = vmatprep.mubr.f32.mxu0 %v1393_v36 }
 0x253   :  { %993 = vmatmul.mubr.f32.gmra.mrb[28].mxu0 %v1397_v37 }
 0x254   :  { %995 = vmatprep.mubr.f32.mxu0 %v1399_v38 }
 0x257   :  { %996 = vmatmul.mubr.f32.gmra.mrb[30].mxu0 %v1403_v39 }
 0x30e   :  { %v976_v63 = vpop.f32.mrb[16].mxu0 }
 0x30f   :  { %v450_v1 = vadd.f32 %v976_v63, %v1408_v40  ;;  %v444_v2 = vpop.f32.mrb[17].mxu0 }
 0x310   :  { %v445_v4 = vadd.f32 %v444_v2, %v1411_v41 }
 0x312   :  { %v1150_v5 = vpack.c.bf16 %v450_v1, %v445_v4  ;;  %v979_v11 = vpop.f32.mrb[18].mxu0 }
 0x313   :  { %v460_v6 = vadd.f32 %v979_v11, %v1414_v43  ;;  %v454_v8 = vpop.f32.mrb[19].mxu0 }
 0x314   :  { %v455_v9 = vadd.f32 %v454_v8, %v1418_v46  ;;  %1151 = vmatprep.subr.bf16.mxu1 %v1150_v5 }
 0x315   :  { %1153 = vmatpush3.bf16.msra.mxu1 %v1150_v5 }
 0x316   :  { %v1154_v12 = vpack.c.bf16 %v460_v6, %v455_v9  ;;  %v982_v13 = vpop.f32.mrb[20].mxu0 }
 0x317   :  { %v470_v14 = vadd.f32 %v982_v13, %v1422_v50  ;;  %v464_v18 = vpop.f32.mrb[21].mxu0 }
 0x318   :  { %v465_v21 = vadd.f32 %v464_v18, %v1426_v53  ;;  %1155 = vmatprep.subr.bf16.mxu1 %v1154_v12 }
 0x319   :  { %1157 = vmatpush3.bf16.msra.mxu1 %v1154_v12 }
 0x31a   :  { %v1158_v24 = vpack.c.bf16 %v470_v14, %v465_v21  ;;  %v985_v16 = vpop.f32.mrb[22].mxu0 }
 0x31b   :  { %v480_v42 = vadd.f32 %v985_v16, %v1430_v57  ;;  %v474_v45 = vpop.f32.mrb[23].mxu0 }
 0x31c   :  { %v475_v47 = vadd.f32 %v474_v45, %v1434_v60  ;;  %1159 = vmatprep.subr.bf16.mxu1 %v1158_v24 }
 0x31d   :  { %1161 = vmatpush3.bf16.msra.mxu1 %v1158_v24 }
 0x31e   :  { %v1162_v48 = vpack.c.bf16 %v480_v42, %v475_v47  ;;  %v988_v19 = vpop.f32.mrb[24].mxu0 }
 0x31f   :  { %v490_v49 = vadd.f32 %v988_v19, %v1438_v0  ;;  %v484_v51 = vpop.f32.mrb[25].mxu0 }
 0x320   :  { %v485_v52 = vadd.f32 %v484_v51, %v1442_v3  ;;  %1163 = vmatprep.subr.bf16.mxu1 %v1162_v48 }
 0x321   :  { %1165 = vmatpush3.bf16.msra.mxu1 %v1162_v48 }
 0x322   :  { %v1166_v54 = vpack.c.bf16 %v490_v49, %v485_v52  ;;  %v991_v23 = vpop.f32.mrb[26].mxu0 }
 0x323   :  { %v500_v22 = vadd.f32 %v991_v23, %v1446_v7  ;;  %v494_v55 = vpop.f32.mrb[27].mxu0 }
 0x324   :  { %v495_v56 = vadd.f32 %v494_v55, %v1450_v10  ;;  %1167 = vmatprep.subr.bf16.mxu1 %v1166_v54 }
 0x325   :  { %1169 = vmatpush3.bf16.msra.mxu1 %v1166_v54 }
 0x326   :  { %v1170_v58 = vpack.c.bf16 %v500_v22, %v495_v56  ;;  %v994_v59 = vpop.f32.mrb[28].mxu0 }
 0x327   :  { %v510_v61 = vadd.f32 %v994_v59, %v1454_v15  ;;  %v504_v62 = vpop.f32.mrb[29].mxu0 }
 0x328   :  { %v505_v63 = vadd.f32 %v504_v62, %v1458_v17  ;;  %1171 = vmatprep.subr.bf16.mxu1 %v1170_v58 }
 0x329   :  { %1173 = vmatpush3.bf16.msra.mxu1 %v1170_v58 }
 0x32a   :  { %v1174_v1 = vpack.c.bf16 %v510_v61, %v505_v63  ;;  %v997_v2 = vpop.f32.mrb[30].mxu0 }
 0x32b   :  { %v520_v4 = vadd.f32 %v997_v2, %v1462_v44  ;;  %v514_v5 = vpop.f32.mrb[31].mxu0 }
 0x32c   :  { %v515_v11 = vadd.f32 %v514_v5, %v1466_v20  ;;  %1175 = vmatprep.subr.bf16.mxu1 %v1174_v1 }
 0x32d   :  { %1177 = vmatpush3.bf16.msra.mxu1 %v1174_v1 }
 0x32e   :  { %v1178_v6 = vpack.c.bf16 %v520_v4, %v515_v11 }
 0x330   :  { %1179 = vmatprep.subr.bf16.mxu1 %v1178_v6 }
 0x331   :  { %1181 = vmatpush3.bf16.msra.mxu1 %v1178_v6 }
 0x334   :  { %1031 = vmatmul.mubr.f32.vlgmr.msra.gmra.mrb[16].mxu1 %v1361_v25 }
 0x335   :  { %1033 = vmatprep.mubr.f32.mxu1 %v1363_v26 }
 0x338   :  { %1034 = vmatmul.mubr.f32.gmra.mrb[18].mxu1 %v1367_v27 }
 0x339   :  { %1036 = vmatprep.mubr.f32.mxu1 %v1369_v28 }
 0x33c   :  { %1037 = vmatmul.mubr.f32.gmra.mrb[20].mxu1 %v1373_v29 }
 0x33d   :  { %1039 = vmatprep.mubr.f32.mxu1 %v1375_v30 }
 0x340   :  { %1040 = vmatmul.mubr.f32.gmra.mrb[22].mxu1 %v1379_v31 }
 0x341   :  { %1042 = vmatprep.mubr.f32.mxu1 %v1381_v32 }
 0x344   :  { %1043 = vmatmul.mubr.f32.gmra.mrb[24].mxu1 %v1385_v33 }
 0x345   :  { %1045 = vmatprep.mubr.f32.mxu1 %v1387_v34 }
 0x348   :  { %1046 = vmatmul.mubr.f32.gmra.mrb[26].mxu1 %v1391_v35 }
 0x349   :  { %1048 = vmatprep.mubr.f32.mxu1 %v1393_v36 }
 0x34c   :  { %1049 = vmatmul.mubr.f32.gmra.mrb[28].mxu1 %v1397_v37 }
 0x34d   :  { %1051 = vmatprep.mubr.f32.mxu1 %v1399_v38 }
 0x350   :  { %1052 = vmatmul.mubr.f32.gmra.mrb[30].mxu1 %v1403_v39 }
 0x407   :  { %v1032_v25 = vpop.f32.mrb[16].mxu1 }
 0x408   :  { %v595_v26 = vadd.f32 %v1032_v25, %v1408_v40  ;;  %v589_v27 = vpop.f32.mrb[17].mxu1 }
 0x409   :  { %v590_v28 = vadd.f32 %v589_v27, %v1411_v41 }
 0x40a   :  { %669 = vst [vmem:[#allocation7 + $0x8] sm:$0xff] %v595_v26 }
 0x40b   :  { %668 = vst [vmem:[#allocation7] sm:$0xff] %v590_v28  ;;  %v1035_v29 = vpop.f32.mrb[18].mxu1 }
 0x40c   :  { %v605_v30 = vadd.f32 %v1035_v29, %v1414_v43  ;;  %v599_v31 = vpop.f32.mrb[19].mxu1 }
 0x40d   :  { %v600_v32 = vadd.f32 %v599_v31, %v1418_v46 }
 0x40e   :  { %671 = vst [vmem:[#allocation7 + $0x18] sm:$0xff] %v605_v30 }
 0x40f   :  { %670 = vst [vmem:[#allocation7 + $0x10] sm:$0xff] %v600_v32  ;;  %v1038_v33 = vpop.f32.mrb[20].mxu1 }
 0x410   :  { %v615_v34 = vadd.f32 %v1038_v33, %v1422_v50  ;;  %v609_v35 = vpop.f32.mrb[21].mxu1 }
 0x411   :  { %v610_v36 = vadd.f32 %v609_v35, %v1426_v53 }
 0x412   :  { %673 = vst [vmem:[#allocation7 + $0x28] sm:$0xff] %v615_v34 }
 0x413   :  { %672 = vst [vmem:[#allocation7 + $0x20] sm:$0xff] %v610_v36  ;;  %v1041_v37 = vpop.f32.mrb[22].mxu1 }
 0x414   :  { %v625_v38 = vadd.f32 %v1041_v37, %v1430_v57  ;;  %v619_v39 = vpop.f32.mrb[23].mxu1 }
 0x415   :  { %v620_v40 = vadd.f32 %v619_v39, %v1434_v60 }
 0x416   :  { %675 = vst [vmem:[#allocation7 + $0x38] sm:$0xff] %v625_v38 }
 0x417   :  { %674 = vst [vmem:[#allocation7 + $0x30] sm:$0xff] %v620_v40  ;;  %v1044_v41 = vpop.f32.mrb[24].mxu1 }
 0x418   :  { %v635_v43 = vadd.f32 %v1044_v41, %v1438_v0  ;;  %v629_v46 = vpop.f32.mrb[25].mxu1 }
 0x419   :  { %v630_v8 = vadd.f32 %v629_v46, %v1442_v3 }
 0x41a   :  { %677 = vst [vmem:[#allocation7 + $0x48] sm:$0xff] %v635_v43 }
 0x41b   :  { %676 = vst [vmem:[#allocation7 + $0x40] sm:$0xff] %v630_v8  ;;  %v1047_v50 = vpop.f32.mrb[26].mxu1 }
 0x41c   :  { %v645_v53 = vadd.f32 %v1047_v50, %v1446_v7  ;;  %v639_v9 = vpop.f32.mrb[27].mxu1 }
 0x41d   :  { %v640_v12 = vadd.f32 %v639_v9, %v1450_v10 }
 0x41e   :  { %679 = vst [vmem:[#allocation7 + $0x58] sm:$0xff] %v645_v53 }
 0x41f   :  { %678 = vst [vmem:[#allocation7 + $0x50] sm:$0xff] %v640_v12  ;;  %v1050_v57 = vpop.f32.mrb[28].mxu1 }
 0x420   :  { %v655_v60 = vadd.f32 %v1050_v57, %v1454_v15  ;;  %v649_v13 = vpop.f32.mrb[29].mxu1 }
 0x421   :  { %v650_v14 = vadd.f32 %v649_v13, %v1458_v17 }
 0x422   :  { %681 = vst [vmem:[#allocation7 + $0x68] sm:$0xff] %v655_v60 }
 0x423   :  { %680 = vst [vmem:[#allocation7 + $0x60] sm:$0xff] %v650_v14  ;;  %v1053_v0 = vpop.f32.mrb[30].mxu1 }
 0x424   :  { %v665_v3 = vadd.f32 %v1053_v0, %v1462_v44  ;;  %v659_v18 = vpop.f32.mrb[31].mxu1 }
 0x425   :  { %v660_v7 = vadd.f32 %v659_v18, %v1466_v20 }
 0x426   :  { %683 = vst [vmem:[#allocation7 + $0x78] sm:$0xff] %v665_v3 }
 0x427   :  { %682 = vst [vmem:[#allocation7 + $0x70] sm:$0xff] %v660_v7 }
 0x428   :  { %1242 = shalt.err (!%p1239_p6)
}
 0x429   :  { %s1243_s10 = scalar_lea.hbm %s1582_s2, 2048 }
 0x42a   :  { %p1244_p7 = scmp.ne.s32.totalorder %s1582_s2, %s1243_s10  ;;  %p1247_p8 = scmp.lt.u32.totalorder %s1243_s10, %s1582_s2 }
 0x42c   :  { %p1249_p9 = pnand %p1247_p8, %p1244_p7 }
 0x42e   :  { %1252 = shalt.err (!%p1249_p9)
}
 0x42f   :  { %695 = dma.vmem_to_hbm [thread:$0]  %s690_s6, 2048, %s1582_s2, [#allocation4], %s1260_s19, %s1260_s19, %s1261_s20  }
 0x430   :  { %1257 = dma.done.wait [#allocation4], 2048  }
 0x431   :  { %1258 = vsyncadd [#allocation4], 4294965248 }
 0x432   :  { %699 = vsyncpa [#allocation3], 1 }
 0x433   :  { %700 = vsyncpa [#allocation6], 1 }
 0x434   :  { %701 = vsyncpa [#allocation4], 1 }

</bundles_post_ra>
